<compile_context>
chip_gen: v7x
topology: tpu7x:2x2x1
jax: 0.10.0
libtpu: 0.0.40
codegen_flags: <defaults>
</compile_context>

<pallas_src>
import math
import numpy as np
import jax
import jax.numpy as jnp
from jax import lax
from jax.experimental import pallas as pl
from jax.experimental.pallas import tpu as pltpu

# ----------------------------- configuration ------------------------------
B = 2                 # batch
T = 4                 # num_frames
C = 8                 # num_features (input channels)
H = W = 8             # spatial (hard-coded to 8 in Tail)
DM = 50               # query_size / d_model (forced by nn.Linear(768, 50))
HEAD = 2              # num_head
DK = DM // HEAD       # 25
DFF = DK // 2         # FeedForward d_ff = d_model // 2 inside TX -> 12
NC = 8                # num_classes (must be divisible by T)
MID = (C + DM) // 2   # 29
QIN = 768             # query input dim (forced by nn.Linear(768, 50))
N = B * T
GSZ = NC // T         # per-frame softmax group size
EPS_NORM = 1e-6
REF_PREC = jax.lax.Precision.HIGHEST   # reference only (true-f32 baseline)

# ---- packed-slab layout (row offsets; bf16 tile = 16 rows, f32 tile = 8) ----
OFF_W2 = 0                       # conv2 weight  (9*MID, DM) = (261, 50)
OFF_WQ = 272                     # query proj    (QIN, DM)   = (768, 50)
OFF_FF1 = OFF_WQ + QIN           # FF1 block-diag, padded    = (50, 50)
OFF_FF2 = OFF_FF1 + 64           # FF2 block-diag, padded    = (50, 50)
OFF_WC = OFF_FF2 + 64            # classifier, padded cols   = (50, 50)
WSLAB_ROWS = OFF_WC + 64         # 1232 rows x 50 lanes, bf16

ROW_B1 = 0                       # conv1 per-sample bias (N, 9*MID)
ROW_GN = 8                       # group-softmax additive mask (N, NC)
ROW_B2 = 16                      # conv2 bias        (lanes 0:DM)
ROW_BQ = 17                      # query proj bias   (lanes 0:DM)
ROW_FFB1 = 18                    # FF1 bias          (lanes 0:HEAD*DFF)
ROW_FFB2 = 19                    # FF2 bias          (lanes 0:DM)
ROW_N1A = 20                     # TX.norm_1 alpha   (lanes 0:DM, heads concat)
ROW_N1B = 21                     # TX.norm_1 bias
ROW_N2A = 22                     # TX.norm_2 alpha
ROW_N2B = 23                     # TX.norm_2 bias
ROW_BC = 24                      # classifier bias   (lanes 0:NC)
FSLAB_ROWS = 25                  # 25 rows x 261 lanes, f32


def _norm_rows(x, alpha, bias):
    """PyTorch `Norm` (reference): alpha*(x-mean)/(std_unbiased + eps) + bias."""
    n = x.shape[-1]
    mu = jnp.mean(x, axis=-1, keepdims=True)
    var = jnp.sum((x - mu) ** 2, axis=-1, keepdims=True) * (1.0 / (n - 1))
    return alpha * (x - mu) / (jnp.sqrt(var) + EPS_NORM) + bias


# ----------------------------- single fused kernel -------------------------
def fused_kernel(patches_ref, query_ref, w1bd_ref, wslab_ref, fslab_ref, out_ref):
    f32, bf16 = jnp.float32, jnp.bfloat16

    def bdot(a, b):  # bf16 MXU matmul, f32 accumulation
        return jnp.dot(a.astype(bf16), b.astype(bf16), preferred_element_type=f32)

    # 0/1 segment / batch-expansion matrices built from iota (no extra DMAs,
    # only mul/compare/select -> VPU).
    def band(shape, val_dim, seg_dim, seg):
        v = lax.broadcasted_iota(jnp.int32, shape, val_dim)
        s = lax.broadcasted_iota(jnp.int32, shape, seg_dim)
        keep = jnp.logical_and(v >= s * seg, v < s * seg + seg)
        return jnp.where(keep, 1.0, 0.0).astype(bf16)

    erep = band((N, B), 0, 1, T)        # (8, 2)  row n -> batch n//T
    hseg = band((DM, HEAD), 0, 1, DK)   # (50, 2) lane d -> head d//DK
    hsegT = band((HEAD, DM), 1, 0, DK)  # (2, 50)

    # ---- static slab views --------------------------------------------------
    w2f = wslab_ref[OFF_W2:OFF_W2 + 9 * MID, :]
    wq = wslab_ref[OFF_WQ:OFF_WQ + QIN, :]
    ffw1 = wslab_ref[OFF_FF1:OFF_FF1 + DM, :]
    ffw2 = wslab_ref[OFF_FF2:OFF_FF2 + DM, :]
    wc = wslab_ref[OFF_WC:OFF_WC + DM, :]

    b1bd = fslab_ref[ROW_B1:ROW_B1 + N, :]
    gneg = fslab_ref[ROW_GN:ROW_GN + N, 0:NC]
    b2f = fslab_ref[ROW_B2:ROW_B2 + 1, 0:DM]
    bq = fslab_ref[ROW_BQ:ROW_BQ + 1, 0:DM]
    ffb1 = fslab_ref[ROW_FFB1:ROW_FFB1 + 1, 0:DM]
    ffb2 = fslab_ref[ROW_FFB2:ROW_FFB2 + 1, 0:DM]
    n1a = fslab_ref[ROW_N1A:ROW_N1A + 1, 0:DM]
    n1b = fslab_ref[ROW_N1B:ROW_N1B + 1, 0:DM]
    n2a = fslab_ref[ROW_N2A:ROW_N2A + 1, 0:DM]
    n2b = fslab_ref[ROW_N2B:ROW_N2B + 1, 0:DM]
    bc = fslab_ref[ROW_BC:ROW_BC + 1, 0:NC]

    # ---- Qpr conv stack: two lane-dense matmuls (BN / sqrt(C) / PE folded) ---
    h1 = jnp.maximum(bdot(patches_ref[...], w1bd_ref[...]) + b1bd, 0.0)   # (N, 261)
    xf = jnp.maximum(bdot(h1, w2f) + b2f, 0.0)                            # (N, 50)
    # the module's extra F.relu(self.Qpr(x)) is a no-op after the ReLU above.

    # ---- bn2 = Norm(d_model, trainable=False): alpha=1, bias=0 ---------------
    mu = jnp.mean(xf, axis=-1, keepdims=True)
    cen = xf - mu
    var = jnp.sum(cen * cen, axis=-1, keepdims=True) * (1.0 / (DM - 1))
    xfn = cen * pl.reciprocal(jnp.sqrt(var) + EPS_NORM, approx=True)      # (N, 50)

    # ---- query projection + ReLU ---------------------------------------------
    q_all = jnp.maximum(bdot(query_ref[...], wq) + bq, 0.0)               # (B, 50)

    # ---- helpers over the temporal (sublane) axis -----------------------------
    def seg_over_t(x, red):            # reduce over t within each batch, bcast back
        parts = []
        for b in range(B):
            r = red(x[b * T:(b + 1) * T, :], axis=0, keepdims=True)
            parts.append(jnp.broadcast_to(r, (T, x.shape[-1])))
        return jnp.concatenate(parts, axis=0)

    def seg_sum_rows(x):               # (N, K) -> (B, K): f32-exact sum over t
        return jnp.concatenate(
            [jnp.sum(x[b * T:(b + 1) * T, :], axis=0, keepdims=True)
             for b in range(B)], axis=0)

    # ---- attention over the temporal axis, all heads/batches at once ---------
    q_rep = bdot(erep, q_all)                                             # (N, 50)
    s = bdot(q_rep * xfn, hseg) * (1.0 / math.sqrt(DK))                   # (N, HEAD)
    m = seg_over_t(s, jnp.max)
    e = jnp.exp(s - m)
    l = seg_over_t(e, jnp.sum)
    p = e * pl.reciprocal(l, approx=True)                                 # (N, HEAD)
    A = seg_sum_rows(bdot(p, hsegT) * xfn)                                # (B, 50)

    # ---- per-head TX: norm_1 -> FeedForward -> norm_2 (lane-segmented) -------
    def seg_norm(x, alpha, bias):
        ssum = bdot(x, hseg)                                              # (B, HEAD)
        mu_ = bdot(ssum * (1.0 / DK), hsegT)                              # (B, 50)
        cen_ = x - mu_
        v_ = bdot(cen_ * cen_, hseg) * (1.0 / (DK - 1))
        inv = pl.reciprocal(jnp.sqrt(v_) + EPS_NORM, approx=True)         # (B, HEAD)
        return alpha * cen_ * bdot(inv, hsegT) + bias

    q_ = seg_norm(A + q_all, n1a, n1b)                                    # (B, 50)
    hdd = jnp.maximum(bdot(q_, ffw1) + ffb1, 0.0)                         # (B, 50); lanes >=24 are 0
    ffo = bdot(hdd, ffw2) + ffb2                                          # (B, 50)
    f = seg_norm(q_ + ffo, n2a, n2b)                                      # (B, 50) = heads concatenated

    # ---- L2 normalize (F.normalize, p=2, dim=1) -------------------------------
    f = f * lax.rsqrt(jnp.maximum(jnp.sum(f * f, axis=-1, keepdims=True), 1e-24))

    # ---- classifier + per-group (per-frame) softmax, per-GROUP max ------------
    f_rep = bdot(erep, f)                                                 # (N, 50)
    logits = bdot(f_rep, wc)[:, 0:NC] + bc + gneg                         # (N, NC); off-group lanes = -1e30
    e2 = jnp.exp(logits - jnp.max(logits, axis=-1, keepdims=True))        # per-group max
    y_nt = e2 * pl.reciprocal(jnp.sum(e2, axis=-1, keepdims=True), approx=True)
    y = seg_sum_rows(y_nt)                                                # (B, NC)

    # ---- single combined store -> single writeback DMA ------------------------
    out_ref[...] = jnp.concatenate([f, y], axis=-1)                       # (B, DM+NC)


# ----------------------------- pallas_call wrapper --------------------------
def temporal_transformer_forward(x, query, fp):
    """x: (B, C, T, H, W) [PyTorch NCTHW], query: (B, 768), fp: folded params."""
    # im2col for conv1 in XLA: (B,C,T,H,W) -> (N,H,W,C) -> (N, 9 positions * 9 taps * C)
    xn = jnp.transpose(x, (0, 2, 3, 4, 1)).reshape(N, H, W, C)
    cols = []
    for oh in range(3):
        for ow in range(3):
            for kh in range(3):
                for kw in range(3):
                    cols.append(xn[:, 2 * oh + kh, 2 * ow + kw, :])
    patches = jnp.concatenate(cols, axis=-1)                              # (N, 648)

    vspec = pl.BlockSpec(memory_space=pltpu.MemorySpace.VMEM)
    # NOTE (v7x): for production batches >> 2, add a leading 'parallel' grid axis
    # over batch to use the second TensorCore; at B=2 a grid-less call is best.
    out = pl.pallas_call(
        fused_kernel,
        out_shape=jax.ShapeDtypeStruct((B, DM + NC), jnp.float32),
        in_specs=[vspec] * 5,
        out_specs=vspec,
        cost_estimate=pl.CostEstimate(flops=3_300_000, transcendentals=256,
                                      bytes_accessed=520_000),
    )(patches, query, fp["w1bd"], fp["wslab"], fp["fslab"])
    return out[:, DM:DM + NC], out[:, 0:DM]        # (y, f)


# ----------------------------- deterministic parameter init -----------------
def make_params(key):
    ks = jax.random.split(key, 26)

    def nrm(k, shape, s=0.1):
        return s * jax.random.normal(k, shape, jnp.float32)

    p = {}
    # bn1 = BatchNorm2d(C), eval: fold (gamma, beta, running_mean, running_var)
    g1 = 1.0 + nrm(ks[0], (C,)); b1 = nrm(ks[1], (C,))
    m1 = nrm(ks[2], (C,)); v1 = 1.0 + 0.1 * jnp.abs(jax.random.normal(ks[3], (C,)))
    s1 = g1 / jnp.sqrt(v1 + 1e-5)
    p["bn1_s"] = s1.reshape(1, C)
    p["bn1_b"] = (b1 - m1 * s1).reshape(1, C)

    # positional encoding table (max_seq_len=T, d_model=C) — exact PyTorch formula
    pe = np.zeros((T, C), np.float32)
    for pos in range(T):
        for i in range(0, C, 2):
            pe[pos, i] = math.sin(pos / 10000 ** (2 * i / C))
            pe[pos, i + 1] = math.cos(pos / 10000 ** (2 * (i + 1) / C))
    p["pe"] = jnp.asarray(pe)

    # Qpr conv1 (MID, C, 3, 3) + BN(MID); conv2 (DM, MID, 3, 3) + BN(DM)
    p["w1_oihw"] = nrm(ks[4], (MID, C, 3, 3), s=math.sqrt(2.0 / (MID * 9)))
    gm = 1.0 + nrm(ks[5], (MID,)); bm = nrm(ks[6], (MID,))
    mm = nrm(ks[7], (MID,)); vm = 1.0 + 0.1 * jnp.abs(jax.random.normal(ks[8], (MID,)))
    sm = gm / jnp.sqrt(vm + 1e-5)
    p["bnm_s"] = sm.reshape(1, MID)
    p["bnm_b"] = (bm - mm * sm).reshape(1, MID)

    p["w2_oihw"] = nrm(ks[9], (DM, MID, 3, 3), s=math.sqrt(2.0 / (DM * 9)))
    gd = 1.0 + nrm(ks[10], (DM,)); bd = nrm(ks[11], (DM,))
    md = nrm(ks[12], (DM,)); vd = 1.0 + 0.1 * jnp.abs(jax.random.normal(ks[13], (DM,)))
    sd = gd / jnp.sqrt(vd + 1e-5)
    p["bnd_s"] = sd.reshape(1, DM)
    p["bnd_b"] = (bd - md * sd).reshape(1, DM)

    # query_projection = Linear(768, 50)
    p["wq"] = nrm(ks[14], (QIN, DM), s=0.05)
    p["bq"] = nrm(ks[15], (DM,), s=0.05).reshape(1, DM)

    # per-head TX (Block_head only uses T1): FeedForward + two Norms
    p["ffw1"] = nrm(ks[16], (HEAD, DK, DFF))
    p["ffb1"] = nrm(ks[17], (HEAD, 1, DFF))
    p["ffw2"] = nrm(ks[18], (HEAD, DFF, DK))
    p["ffb2"] = nrm(ks[19], (HEAD, 1, DK))
    p["n1a"] = 1.0 + nrm(ks[20], (HEAD, 1, DK))
    p["n1b"] = nrm(ks[21], (HEAD, 1, DK))
    p["n2a"] = 1.0 + nrm(ks[22], (HEAD, 1, DK))
    p["n2b"] = nrm(ks[23], (HEAD, 1, DK))

    # classifier = Linear(DM, NC)
    p["wc"] = nrm(ks[24], (DM, NC))
    p["bc"] = nrm(ks[25], (NC,)).reshape(1, NC)
    return p


def fold_params(p):
    """Fold BN scales/shifts, sqrt(C) and the positional encoding into the conv
    weights/biases, build the block-diagonal im2col / per-head weights, and pack
    everything into 3 slabs (bf16 weights, f32 biases/affines/masks)."""
    sqc = math.sqrt(C)
    s1 = np.asarray(p["bn1_s"], np.float64).reshape(C)
    t1 = np.asarray(p["bn1_b"], np.float64).reshape(C)
    sm = np.asarray(p["bnm_s"], np.float64).reshape(MID)
    tm = np.asarray(p["bnm_b"], np.float64).reshape(MID)
    sd = np.asarray(p["bnd_s"], np.float64).reshape(DM)
    td = np.asarray(p["bnd_b"], np.float64).reshape(DM)
    pe = np.asarray(p["pe"], np.float64)[:T]                      # (T, C)

    # conv1: fold bn1 scale*sqrt(C) (Cin) and BN(mid) scale (Cout); block-diag im2col
    w1 = np.asarray(p["w1_oihw"], np.float64)                     # (MID, C, 3, 3)
    w1f = w1 * (s1 * sqc)[None, :, None, None] * sm[:, None, None, None]
    w1f = np.transpose(w1f, (2, 3, 1, 0)).reshape(9 * C, MID)     # rows = (kh, kw, cin)
    w1bd = np.zeros((9 * 9 * C, 9 * MID), np.float64)             # (648, 261)
    for pos in range(9):
        w1bd[pos * 9 * C:(pos + 1) * 9 * C, pos * MID:(pos + 1) * MID] = w1f

    # per-sample additive term (bn1 shift*sqrt(C) + pe) pushed through conv1+BN(mid)
    d1 = np.tile(t1[None, :] * sqc + pe, (B, 1))                  # (N, C), row n -> t = n % T
    b1 = (d1 @ w1.sum(axis=(2, 3)).T) * sm[None, :] + tm[None, :]  # (N, MID)
    b1bd = np.tile(b1, (1, 9))                                    # (N, 261)

    # conv2 (BN(d_model) scale folded), im2col rows = (pos, cmid)
    w2 = np.asarray(p["w2_oihw"], np.float64)                     # (DM, MID, 3, 3)
    w2f = np.transpose(w2 * sd[:, None, None, None], (2, 3, 1, 0)).reshape(9 * MID, DM)

    # ---- bf16 weight slab (lane width DM) -------------------------------------
    wslab = np.zeros((WSLAB_ROWS, DM), np.float32)
    wslab[OFF_W2:OFF_W2 + 9 * MID, :] = w2f
    wslab[OFF_WQ:OFF_WQ + QIN, :] = np.asarray(p["wq"], np.float32)
    ffw1 = np.asarray(p["ffw1"], np.float32)
    ffw2 = np.asarray(p["ffw2"], np.float32)
    for h in range(HEAD):                                         # block-diagonal FF
        wslab[OFF_FF1 + h * DK:OFF_FF1 + (h + 1) * DK, h * DFF:(h + 1) * DFF] = ffw1[h]
        wslab[OFF_FF2 + h * DFF:OFF_FF2 + (h + 1) * DFF, h * DK:(h + 1) * DK] = ffw2[h]
    wslab[OFF_WC:OFF_WC + DM, 0:NC] = np.asarray(p["wc"], np.float32)

    # ---- f32 bias / affine / mask slab (lane width 9*MID) ---------------------
    fslab = np.zeros((FSLAB_ROWS, 9 * MID), np.float32)
    fslab[ROW_B1:ROW_B1 + N, :] = b1bd
    gneg = np.full((N, NC), -1e30, np.float32)                    # per-group softmax mask
    for n in range(N):
        t = n % T
        gneg[n, GSZ * t:GSZ * (t + 1)] = 0.0
    fslab[ROW_GN:ROW_GN + N, 0:NC] = gneg
    fslab[ROW_B2, 0:DM] = td
    fslab[ROW_BQ, 0:DM] = np.asarray(p["bq"], np.float32).reshape(DM)
    fslab[ROW_FFB1, 0:HEAD * DFF] = np.asarray(p["ffb1"], np.float32).reshape(HEAD * DFF)
    fslab[ROW_FFB2, 0:DM] = np.asarray(p["ffb2"], np.float32).reshape(DM)
    fslab[ROW_N1A, 0:DM] = np.asarray(p["n1a"], np.float32).reshape(DM)
    fslab[ROW_N1B, 0:DM] = np.asarray(p["n1b"], np.float32).reshape(DM)
    fslab[ROW_N2A, 0:DM] = np.asarray(p["n2a"], np.float32).reshape(DM)
    fslab[ROW_N2B, 0:DM] = np.asarray(p["n2b"], np.float32).reshape(DM)
    fslab[ROW_BC, 0:NC] = np.asarray(p["bc"], np.float32).reshape(NC)

    return {"w1bd": jnp.asarray(w1bd, jnp.bfloat16),
            "wslab": jnp.asarray(wslab, jnp.bfloat16),
            "fslab": jnp.asarray(fslab, jnp.float32)}


# ----------------------------- pure-JAX reference ---------------------------
def reference_forward(x, query, p):
    x5 = jnp.transpose(x, (0, 2, 1, 3, 4)).reshape(N, C, H, W)
    xb = x5 * p["bn1_s"].reshape(1, C, 1, 1) + p["bn1_b"].reshape(1, C, 1, 1)
    xb = xb.reshape(B, T, C, H, W)
    xb = xb * math.sqrt(C) + p["pe"][:T][None, :, :, None, None]
    xb = xb.reshape(N, C, H, W)
    h1 = lax.conv_general_dilated(xb, p["w1_oihw"], (2, 2), "VALID",
                                  dimension_numbers=("NCHW", "OIHW", "NCHW"),
                                  precision=REF_PREC)
    h1 = jnp.maximum(h1 * p["bnm_s"].reshape(1, MID, 1, 1)
                     + p["bnm_b"].reshape(1, MID, 1, 1), 0.0)
    h2 = lax.conv_general_dilated(h1, p["w2_oihw"], (2, 2), "VALID",
                                  dimension_numbers=("NCHW", "OIHW", "NCHW"),
                                  precision=REF_PREC)
    h2 = jnp.maximum(h2 * p["bnd_s"].reshape(1, DM, 1, 1)
                     + p["bnd_b"].reshape(1, DM, 1, 1), 0.0)
    h2 = jnp.maximum(h2, 0.0)
    xf = h2.reshape(B, T, DM)
    xfn = _norm_rows(xf, 1.0, 0.0)
    q_all = jnp.maximum(jnp.dot(query, p["wq"], precision=REF_PREC) + p["bq"], 0.0)
    outs = []
    for i in range(HEAD):
        qi = q_all[:, i * DK:(i + 1) * DK]
        ki = xfn[:, :, i * DK:(i + 1) * DK]
        vi = ki
        s = jnp.sum(qi[:, None, :] * ki, axis=-1) / math.sqrt(DK)
        smx = jax.nn.softmax(s, axis=-1)
        A = jnp.sum(smx[:, :, None] * vi, axis=1)
        q_ = _norm_rows(A + qi, p["n1a"][i], p["n1b"][i])
        hdd = jnp.maximum(jnp.dot(q_, p["ffw1"][i], precision=REF_PREC) + p["ffb1"][i], 0.0)
        ffo = jnp.dot(hdd, p["ffw2"][i], precision=REF_PREC) + p["ffb2"][i]
        outs.append(_norm_rows(q_ + ffo, p["n2a"][i], p["n2b"][i]))
    f = jnp.concatenate(outs, axis=1)
    f = f / jnp.maximum(jnp.sqrt(jnp.sum(f * f, axis=1, keepdims=True)), 1e-12)
    logits = jnp.dot(f, p["wc"], precision=REF_PREC) + p["bc"]
    y = jax.nn.softmax(logits.reshape(B, T, NC // T), axis=-1).reshape(B, NC)
    return y, f


# ----------------------------- main ------------------------------------------
if __name__ == "__main__":
    key = jax.random.PRNGKey(0)
    kx, kq, kp = jax.random.split(key, 3)
    x = jax.random.normal(kx, (B, C, T, H, W), jnp.float32)     # (b, C, T, 8, 8)
    query = jax.random.normal(kq, (B, QIN), jnp.float32)        # (b, 768)
    params = make_params(kp)
    fparams = fold_params(params)

    fwd = jax.jit(temporal_transformer_forward)
    y, f = fwd(x, query, fparams)
    y = jax.block_until_ready(y)
    f = jax.block_until_ready(f)

    y_ref, f_ref = reference_forward(x, query, params)
    assert y.shape == (B, NC) and f.shape == (B, DM)
    # Kernel matmuls use bf16 operands (f32 accumulation) and EUP approx
    # reciprocals; the reference runs at HIGHEST f32 precision, so allow a
    # correspondingly looser tolerance.
    assert bool(jnp.allclose(y, y_ref, atol=2e-2, rtol=2e-2)), "y mismatch vs reference"
    assert bool(jnp.allclose(f, f_ref, atol=2e-2, rtol=2e-2)), "f mismatch vs reference"
    print("KERNEL_OK")
</pallas_src>

<mosaic_0001>
module attributes {stable_mosaic.version = 11 : i64} {
  func.func @fused_kernel(%arg0: memref<8x648xf32, #tpu.memory_space<vmem>>, %arg1: memref<2x768xf32, #tpu.memory_space<vmem>>, %arg2: memref<648x261xbf16, #tpu.memory_space<vmem>>, %arg3: memref<1232x50xbf16, #tpu.memory_space<vmem>>, %arg4: memref<25x261xf32, #tpu.memory_space<vmem>>, %arg5: memref<2x58xf32, #tpu.memory_space<vmem>>) attributes {dimension_semantics = [], scalar_prefetch = 0 : i64, scratch_operands = 0 : i64, tpu.core_type = #tpu.core_type<tc>} {
    %0 = tpu.iota {dimensions = array<i32: 0>} : vector<8x2xi32>
    %1 = tpu.iota {dimensions = array<i32: 1>} : vector<8x2xi32>
    %c4_i32 = arith.constant 4 : i32
    %2 = vector.broadcast %c4_i32 : i32 to vector<8x2xi32>
    %3 = arith.muli %1, %2 : vector<8x2xi32>
    %4 = arith.cmpi sge, %0, %3 : vector<8x2xi32>
    %c4_i32_0 = arith.constant 4 : i32
    %5 = vector.broadcast %c4_i32_0 : i32 to vector<8x2xi32>
    %6 = arith.muli %1, %5 : vector<8x2xi32>
    %c4_i32_1 = arith.constant 4 : i32
    %7 = vector.broadcast %c4_i32_1 : i32 to vector<8x2xi32>
    %8 = arith.addi %6, %7 : vector<8x2xi32>
    %9 = arith.cmpi slt, %0, %8 : vector<8x2xi32>
    %10 = arith.andi %4, %9 : vector<8x2xi1>
    %cst = arith.constant 1.000000e+00 : f32
    %cst_2 = arith.constant 0.000000e+00 : f32
    %11 = vector.broadcast %cst : f32 to vector<8x2xf32>
    %12 = vector.broadcast %cst_2 : f32 to vector<8x2xf32>
    %13 = arith.select %10, %11, %12 : vector<8x2xi1>, vector<8x2xf32>
    %14 = arith.truncf %13 : vector<8x2xf32> to vector<8x2xbf16>
    %15 = tpu.iota {dimensions = array<i32: 0>} : vector<50x2xi32>
    %16 = tpu.iota {dimensions = array<i32: 1>} : vector<50x2xi32>
    %c25_i32 = arith.constant 25 : i32
    %17 = vector.broadcast %c25_i32 : i32 to vector<50x2xi32>
    %18 = arith.muli %16, %17 : vector<50x2xi32>
    %19 = arith.cmpi sge, %15, %18 : vector<50x2xi32>
    %c25_i32_3 = arith.constant 25 : i32
    %20 = vector.broadcast %c25_i32_3 : i32 to vector<50x2xi32>
    %21 = arith.muli %16, %20 : vector<50x2xi32>
    %c25_i32_4 = arith.constant 25 : i32
    %22 = vector.broadcast %c25_i32_4 : i32 to vector<50x2xi32>
    %23 = arith.addi %21, %22 : vector<50x2xi32>
    %24 = arith.cmpi slt, %15, %23 : vector<50x2xi32>
    %25 = arith.andi %19, %24 : vector<50x2xi1>
    %cst_5 = arith.constant 1.000000e+00 : f32
    %cst_6 = arith.constant 0.000000e+00 : f32
    %26 = vector.broadcast %cst_5 : f32 to vector<50x2xf32>
    %27 = vector.broadcast %cst_6 : f32 to vector<50x2xf32>
    %28 = arith.select %25, %26, %27 : vector<50x2xi1>, vector<50x2xf32>
    %29 = arith.truncf %28 : vector<50x2xf32> to vector<50x2xbf16>
    %30 = tpu.iota {dimensions = array<i32: 1>} : vector<2x50xi32>
    %31 = tpu.iota {dimensions = array<i32: 0>} : vector<2x50xi32>
    %c25_i32_7 = arith.constant 25 : i32
    %32 = vector.broadcast %c25_i32_7 : i32 to vector<2x50xi32>
    %33 = arith.muli %31, %32 : vector<2x50xi32>
    %34 = arith.cmpi sge, %30, %33 : vector<2x50xi32>
    %c25_i32_8 = arith.constant 25 : i32
    %35 = vector.broadcast %c25_i32_8 : i32 to vector<2x50xi32>
    %36 = arith.muli %31, %35 : vector<2x50xi32>
    %c25_i32_9 = arith.constant 25 : i32
    %37 = vector.broadcast %c25_i32_9 : i32 to vector<2x50xi32>
    %38 = arith.addi %36, %37 : vector<2x50xi32>
    %39 = arith.cmpi slt, %30, %38 : vector<2x50xi32>
    %40 = arith.andi %34, %39 : vector<2x50xi1>
    %cst_10 = arith.constant 1.000000e+00 : f32
    %cst_11 = arith.constant 0.000000e+00 : f32
    %41 = vector.broadcast %cst_10 : f32 to vector<2x50xf32>
    %42 = vector.broadcast %cst_11 : f32 to vector<2x50xf32>
    %43 = arith.select %40, %41, %42 : vector<2x50xi1>, vector<2x50xf32>
    %44 = arith.truncf %43 : vector<2x50xf32> to vector<2x50xbf16>
    %c0 = arith.constant 0 : index
    %c0_12 = arith.constant 0 : index
    %45 = vector.load %arg3[%c0, %c0_12] : memref<1232x50xbf16, #tpu.memory_space<vmem>>, vector<261x50xbf16>
    %c272 = arith.constant 272 : index
    %c0_13 = arith.constant 0 : index
    %46 = vector.load %arg3[%c272, %c0_13] : memref<1232x50xbf16, #tpu.memory_space<vmem>>, vector<768x50xbf16>
    %c1040 = arith.constant 1040 : index
    %c0_14 = arith.constant 0 : index
    %47 = vector.load %arg3[%c1040, %c0_14] : memref<1232x50xbf16, #tpu.memory_space<vmem>>, vector<50x50xbf16>
    %c1104 = arith.constant 1104 : index
    %c0_15 = arith.constant 0 : index
    %48 = vector.load %arg3[%c1104, %c0_15] : memref<1232x50xbf16, #tpu.memory_space<vmem>>, vector<50x50xbf16>
    %c1168 = arith.constant 1168 : index
    %c0_16 = arith.constant 0 : index
    %49 = vector.load %arg3[%c1168, %c0_16] : memref<1232x50xbf16, #tpu.memory_space<vmem>>, vector<50x50xbf16>
    %c0_17 = arith.constant 0 : index
    %c0_18 = arith.constant 0 : index
    %50 = vector.load %arg4[%c0_17, %c0_18] : memref<25x261xf32, #tpu.memory_space<vmem>>, vector<8x261xf32>
    %c8 = arith.constant 8 : index
    %c0_19 = arith.constant 0 : index
    %51 = vector.load %arg4[%c8, %c0_19] : memref<25x261xf32, #tpu.memory_space<vmem>>, vector<8x8xf32>
    %c16 = arith.constant 16 : index
    %c0_20 = arith.constant 0 : index
    %52 = vector.load %arg4[%c16, %c0_20] : memref<25x261xf32, #tpu.memory_space<vmem>>, vector<1x50xf32>
    %c17 = arith.constant 17 : index
    %c0_21 = arith.constant 0 : index
    %53 = vector.load %arg4[%c17, %c0_21] : memref<25x261xf32, #tpu.memory_space<vmem>>, vector<1x50xf32>
    %c18 = arith.constant 18 : index
    %c0_22 = arith.constant 0 : index
    %54 = vector.load %arg4[%c18, %c0_22] : memref<25x261xf32, #tpu.memory_space<vmem>>, vector<1x50xf32>
    %c19 = arith.constant 19 : index
    %c0_23 = arith.constant 0 : index
    %55 = vector.load %arg4[%c19, %c0_23] : memref<25x261xf32, #tpu.memory_space<vmem>>, vector<1x50xf32>
    %c20 = arith.constant 20 : index
    %c0_24 = arith.constant 0 : index
    %56 = vector.load %arg4[%c20, %c0_24] : memref<25x261xf32, #tpu.memory_space<vmem>>, vector<1x50xf32>
    %c21 = arith.constant 21 : index
    %c0_25 = arith.constant 0 : index
    %57 = vector.load %arg4[%c21, %c0_25] : memref<25x261xf32, #tpu.memory_space<vmem>>, vector<1x50xf32>
    %c22 = arith.constant 22 : index
    %c0_26 = arith.constant 0 : index
    %58 = vector.load %arg4[%c22, %c0_26] : memref<25x261xf32, #tpu.memory_space<vmem>>, vector<1x50xf32>
    %c23 = arith.constant 23 : index
    %c0_27 = arith.constant 0 : index
    %59 = vector.load %arg4[%c23, %c0_27] : memref<25x261xf32, #tpu.memory_space<vmem>>, vector<1x50xf32>
    %c24 = arith.constant 24 : index
    %c0_28 = arith.constant 0 : index
    %60 = vector.load %arg4[%c24, %c0_28] : memref<25x261xf32, #tpu.memory_space<vmem>>, vector<1x8xf32>
    %c0_29 = arith.constant 0 : index
    %c0_30 = arith.constant 0 : index
    %61 = vector.load %arg0[%c0_29, %c0_30] : memref<8x648xf32, #tpu.memory_space<vmem>>, vector<8x648xf32>
    %c0_31 = arith.constant 0 : index
    %c0_32 = arith.constant 0 : index
    %62 = vector.load %arg2[%c0_31, %c0_32] : memref<648x261xbf16, #tpu.memory_space<vmem>>, vector<648x261xbf16>
    %63 = arith.truncf %61 : vector<8x648xf32> to vector<8x648xbf16>
    %cst_33 = arith.constant dense<0.000000e+00> : vector<8x261xf32>
    %64 = tpu.matmul %63, %62, %cst_33 {dimension_numbers = #tpu.dot_dimension_numbers<[1], [0], [0], [1], [0, 0, 1, 1], [], []>} : vector<8x648xbf16>, vector<648x261xbf16>, vector<8x261xf32> -> vector<8x261xf32>
    %65 = arith.addf %64, %50 : vector<8x261xf32>
    %cst_34 = arith.constant 0.000000e+00 : f32
    %66 = vector.broadcast %cst_34 : f32 to vector<8x261xf32>
    %67 = arith.maximumf %65, %66 : vector<8x261xf32>
    %68 = arith.truncf %67 : vector<8x261xf32> to vector<8x261xbf16>
    %cst_35 = arith.constant dense<0.000000e+00> : vector<8x50xf32>
    %69 = tpu.matmul %68, %45, %cst_35 {dimension_numbers = #tpu.dot_dimension_numbers<[1], [0], [0], [1], [0, 0, 1, 1], [], []>} : vector<8x261xbf16>, vector<261x50xbf16>, vector<8x50xf32> -> vector<8x50xf32>
    %70 = vector.broadcast %52 : vector<1x50xf32> to vector<8x50xf32>
    %71 = arith.addf %69, %70 : vector<8x50xf32>
    %cst_36 = arith.constant 0.000000e+00 : f32
    %72 = vector.broadcast %cst_36 : f32 to vector<8x50xf32>
    %73 = arith.maximumf %71, %72 : vector<8x50xf32>
    %cst_37 = arith.constant dense<0.000000e+00> : vector<8xf32>
    %74 = vector.multi_reduction <add>, %73, %cst_37 [1] : vector<8x50xf32> to vector<8xf32>
    %75 = vector.shape_cast %74 : vector<8xf32> to vector<8x1xf32>
    %cst_38 = arith.constant 5.000000e+01 : f32
    %76 = vector.broadcast %cst_38 : f32 to vector<8x1xf32>
    %77 = arith.divf %75, %76 : vector<8x1xf32>
    %78 = vector.broadcast %77 : vector<8x1xf32> to vector<8x50xf32>
    %79 = arith.subf %73, %78 : vector<8x50xf32>
    %80 = arith.mulf %79, %79 : vector<8x50xf32>
    %cst_39 = arith.constant dense<0.000000e+00> : vector<8xf32>
    %81 = vector.multi_reduction <add>, %80, %cst_39 [1] : vector<8x50xf32> to vector<8xf32>
    %82 = vector.shape_cast %81 : vector<8xf32> to vector<8x1xf32>
    %cst_40 = arith.constant 0.0204081628 : f32
    %83 = vector.broadcast %cst_40 : f32 to vector<8x1xf32>
    %84 = arith.mulf %82, %83 : vector<8x1xf32>
    %85 = math.sqrt %84 : vector<8x1xf32>
    %cst_41 = arith.constant 9.99999997E-7 : f32
    %86 = vector.broadcast %cst_41 : f32 to vector<8x1xf32>
    %87 = arith.addf %85, %86 : vector<8x1xf32>
    %88 = tpu.reciprocal %87 {approx = true} : vector<8x1xf32> -> vector<8x1xf32>
    %89 = vector.broadcast %88 : vector<8x1xf32> to vector<8x50xf32>
    %90 = arith.mulf %79, %89 : vector<8x50xf32>
    %c0_42 = arith.constant 0 : index
    %c0_43 = arith.constant 0 : index
    %91 = vector.load %arg1[%c0_42, %c0_43] : memref<2x768xf32, #tpu.memory_space<vmem>>, vector<2x768xf32>
    %92 = arith.truncf %91 : vector<2x768xf32> to vector<2x768xbf16>
    %cst_44 = arith.constant dense<0.000000e+00> : vector<2x50xf32>
    %93 = tpu.matmul %92, %46, %cst_44 {dimension_numbers = #tpu.dot_dimension_numbers<[1], [0], [0], [1], [0, 0, 1, 1], [], []>} : vector<2x768xbf16>, vector<768x50xbf16>, vector<2x50xf32> -> vector<2x50xf32>
    %94 = vector.broadcast %53 : vector<1x50xf32> to vector<2x50xf32>
    %95 = arith.addf %93, %94 : vector<2x50xf32>
    %cst_45 = arith.constant 0.000000e+00 : f32
    %96 = vector.broadcast %cst_45 : f32 to vector<2x50xf32>
    %97 = arith.maximumf %95, %96 : vector<2x50xf32>
    %98 = arith.truncf %97 : vector<2x50xf32> to vector<2x50xbf16>
    %cst_46 = arith.constant dense<0.000000e+00> : vector<8x50xf32>
    %99 = tpu.matmul %14, %98, %cst_46 {dimension_numbers = #tpu.dot_dimension_numbers<[1], [0], [0], [1], [0, 0, 1, 1], [], []>} : vector<8x2xbf16>, vector<2x50xbf16>, vector<8x50xf32> -> vector<8x50xf32>
    %100 = arith.mulf %99, %90 : vector<8x50xf32>
    %101 = arith.truncf %100 : vector<8x50xf32> to vector<8x50xbf16>
    %cst_47 = arith.constant dense<0.000000e+00> : vector<8x2xf32>
    %102 = tpu.matmul %101, %29, %cst_47 {dimension_numbers = #tpu.dot_dimension_numbers<[1], [0], [0], [1], [0, 0, 1, 1], [], []>} : vector<8x50xbf16>, vector<50x2xbf16>, vector<8x2xf32> -> vector<8x2xf32>
    %cst_48 = arith.constant 2.000000e-01 : f32
    %103 = vector.broadcast %cst_48 : f32 to vector<8x2xf32>
    %104 = arith.mulf %102, %103 : vector<8x2xf32>
    %105 = vector.extract_strided_slice %104 {offsets = [0, 0], sizes = [4, 2], strides = [1, 1]} : vector<8x2xf32> to vector<4x2xf32>
    %cst_49 = arith.constant dense<0xFF800000> : vector<2xf32>
    %106 = vector.multi_reduction <maximumf>, %105, %cst_49 [0] : vector<4x2xf32> to vector<2xf32>
    %107 = vector.shape_cast %106 : vector<2xf32> to vector<1x2xf32>
    %108 = vector.shape_cast %107 : vector<1x2xf32> to vector<1x2xf32>
    %109 = vector.broadcast %108 : vector<1x2xf32> to vector<4x2xf32>
    %110 = vector.extract_strided_slice %104 {offsets = [4, 0], sizes = [4, 2], strides = [1, 1]} : vector<8x2xf32> to vector<4x2xf32>
    %cst_50 = arith.constant dense<0xFF800000> : vector<2xf32>
    %111 = vector.multi_reduction <maximumf>, %110, %cst_50 [0] : vector<4x2xf32> to vector<2xf32>
    %112 = vector.shape_cast %111 : vector<2xf32> to vector<1x2xf32>
    %113 = vector.shape_cast %112 : vector<1x2xf32> to vector<1x2xf32>
    %114 = vector.broadcast %113 : vector<1x2xf32> to vector<4x2xf32>
    %115 = tpu.concatenate %109, %114 in 0 : vector<4x2xf32>, vector<4x2xf32> -> vector<8x2xf32>
    %116 = arith.subf %104, %115 : vector<8x2xf32>
    %117 = math.exp %116 : vector<8x2xf32>
    %118 = vector.extract_strided_slice %117 {offsets = [0, 0], sizes = [4, 2], strides = [1, 1]} : vector<8x2xf32> to vector<4x2xf32>
    %cst_51 = arith.constant dense<0.000000e+00> : vector<2xf32>
    %119 = vector.multi_reduction <add>, %118, %cst_51 [0] : vector<4x2xf32> to vector<2xf32>
    %120 = vector.shape_cast %119 : vector<2xf32> to vector<1x2xf32>
    %121 = vector.shape_cast %120 : vector<1x2xf32> to vector<1x2xf32>
    %122 = vector.broadcast %121 : vector<1x2xf32> to vector<4x2xf32>
    %123 = vector.extract_strided_slice %117 {offsets = [4, 0], sizes = [4, 2], strides = [1, 1]} : vector<8x2xf32> to vector<4x2xf32>
    %cst_52 = arith.constant dense<0.000000e+00> : vector<2xf32>
    %124 = vector.multi_reduction <add>, %123, %cst_52 [0] : vector<4x2xf32> to vector<2xf32>
    %125 = vector.shape_cast %124 : vector<2xf32> to vector<1x2xf32>
    %126 = vector.shape_cast %125 : vector<1x2xf32> to vector<1x2xf32>
    %127 = vector.broadcast %126 : vector<1x2xf32> to vector<4x2xf32>
    %128 = tpu.concatenate %122, %127 in 0 : vector<4x2xf32>, vector<4x2xf32> -> vector<8x2xf32>
    %129 = tpu.reciprocal %128 {approx = true} : vector<8x2xf32> -> vector<8x2xf32>
    %130 = arith.mulf %117, %129 : vector<8x2xf32>
    %131 = arith.truncf %130 : vector<8x2xf32> to vector<8x2xbf16>
    %cst_53 = arith.constant dense<0.000000e+00> : vector<8x50xf32>
    %132 = tpu.matmul %131, %44, %cst_53 {dimension_numbers = #tpu.dot_dimension_numbers<[1], [0], [0], [1], [0, 0, 1, 1], [], []>} : vector<8x2xbf16>, vector<2x50xbf16>, vector<8x50xf32> -> vector<8x50xf32>
    %133 = arith.mulf %132, %90 : vector<8x50xf32>
    %134 = vector.extract_strided_slice %133 {offsets = [0, 0], sizes = [4, 50], strides = [1, 1]} : vector<8x50xf32> to vector<4x50xf32>
    %cst_54 = arith.constant dense<0.000000e+00> : vector<50xf32>
    %135 = vector.multi_reduction <add>, %134, %cst_54 [0] : vector<4x50xf32> to vector<50xf32>
    %136 = vector.shape_cast %135 : vector<50xf32> to vector<1x50xf32>
    %137 = vector.extract_strided_slice %133 {offsets = [4, 0], sizes = [4, 50], strides = [1, 1]} : vector<8x50xf32> to vector<4x50xf32>
    %cst_55 = arith.constant dense<0.000000e+00> : vector<50xf32>
    %138 = vector.multi_reduction <add>, %137, %cst_55 [0] : vector<4x50xf32> to vector<50xf32>
    %139 = vector.shape_cast %138 : vector<50xf32> to vector<1x50xf32>
    %140 = tpu.concatenate %136, %139 in 0 : vector<1x50xf32>, vector<1x50xf32> -> vector<2x50xf32>
    %141 = arith.addf %140, %97 : vector<2x50xf32>
    %142 = arith.truncf %141 : vector<2x50xf32> to vector<2x50xbf16>
    %cst_56 = arith.constant dense<0.000000e+00> : vector<2x2xf32>
    %143 = tpu.matmul %142, %29, %cst_56 {dimension_numbers = #tpu.dot_dimension_numbers<[1], [0], [0], [1], [0, 0, 1, 1], [], []>} : vector<2x50xbf16>, vector<50x2xbf16>, vector<2x2xf32> -> vector<2x2xf32>
    %cst_57 = arith.constant 4.000000e-02 : f32
    %144 = vector.broadcast %cst_57 : f32 to vector<2x2xf32>
    %145 = arith.mulf %143, %144 : vector<2x2xf32>
    %146 = arith.truncf %145 : vector<2x2xf32> to vector<2x2xbf16>
    %cst_58 = arith.constant dense<0.000000e+00> : vector<2x50xf32>
    %147 = tpu.matmul %146, %44, %cst_58 {dimension_numbers = #tpu.dot_dimension_numbers<[1], [0], [0], [1], [0, 0, 1, 1], [], []>} : vector<2x2xbf16>, vector<2x50xbf16>, vector<2x50xf32> -> vector<2x50xf32>
    %148 = arith.subf %141, %147 : vector<2x50xf32>
    %149 = arith.mulf %148, %148 : vector<2x50xf32>
    %150 = arith.truncf %149 : vector<2x50xf32> to vector<2x50xbf16>
    %cst_59 = arith.constant dense<0.000000e+00> : vector<2x2xf32>
    %151 = tpu.matmul %150, %29, %cst_59 {dimension_numbers = #tpu.dot_dimension_numbers<[1], [0], [0], [1], [0, 0, 1, 1], [], []>} : vector<2x50xbf16>, vector<50x2xbf16>, vector<2x2xf32> -> vector<2x2xf32>
    %cst_60 = arith.constant 0.0416666679 : f32
    %152 = vector.broadcast %cst_60 : f32 to vector<2x2xf32>
    %153 = arith.mulf %151, %152 : vector<2x2xf32>
    %154 = math.sqrt %153 : vector<2x2xf32>
    %cst_61 = arith.constant 9.99999997E-7 : f32
    %155 = vector.broadcast %cst_61 : f32 to vector<2x2xf32>
    %156 = arith.addf %154, %155 : vector<2x2xf32>
    %157 = tpu.reciprocal %156 {approx = true} : vector<2x2xf32> -> vector<2x2xf32>
    %158 = vector.broadcast %56 : vector<1x50xf32> to vector<2x50xf32>
    %159 = arith.mulf %158, %148 : vector<2x50xf32>
    %160 = arith.truncf %157 : vector<2x2xf32> to vector<2x2xbf16>
    %cst_62 = arith.constant dense<0.000000e+00> : vector<2x50xf32>
    %161 = tpu.matmul %160, %44, %cst_62 {dimension_numbers = #tpu.dot_dimension_numbers<[1], [0], [0], [1], [0, 0, 1, 1], [], []>} : vector<2x2xbf16>, vector<2x50xbf16>, vector<2x50xf32> -> vector<2x50xf32>
    %162 = arith.mulf %159, %161 : vector<2x50xf32>
    %163 = vector.broadcast %57 : vector<1x50xf32> to vector<2x50xf32>
    %164 = arith.addf %162, %163 : vector<2x50xf32>
    %165 = arith.truncf %164 : vector<2x50xf32> to vector<2x50xbf16>
    %cst_63 = arith.constant dense<0.000000e+00> : vector<2x50xf32>
    %166 = tpu.matmul %165, %47, %cst_63 {dimension_numbers = #tpu.dot_dimension_numbers<[1], [0], [0], [1], [0, 0, 1, 1], [], []>} : vector<2x50xbf16>, vector<50x50xbf16>, vector<2x50xf32> -> vector<2x50xf32>
    %167 = vector.broadcast %54 : vector<1x50xf32> to vector<2x50xf32>
    %168 = arith.addf %166, %167 : vector<2x50xf32>
    %cst_64 = arith.constant 0.000000e+00 : f32
    %169 = vector.broadcast %cst_64 : f32 to vector<2x50xf32>
    %170 = arith.maximumf %168, %169 : vector<2x50xf32>
    %171 = arith.truncf %170 : vector<2x50xf32> to vector<2x50xbf16>
    %cst_65 = arith.constant dense<0.000000e+00> : vector<2x50xf32>
    %172 = tpu.matmul %171, %48, %cst_65 {dimension_numbers = #tpu.dot_dimension_numbers<[1], [0], [0], [1], [0, 0, 1, 1], [], []>} : vector<2x50xbf16>, vector<50x50xbf16>, vector<2x50xf32> -> vector<2x50xf32>
    %173 = vector.broadcast %55 : vector<1x50xf32> to vector<2x50xf32>
    %174 = arith.addf %172, %173 : vector<2x50xf32>
    %175 = arith.addf %164, %174 : vector<2x50xf32>
    %176 = arith.truncf %175 : vector<2x50xf32> to vector<2x50xbf16>
    %cst_66 = arith.constant dense<0.000000e+00> : vector<2x2xf32>
    %177 = tpu.matmul %176, %29, %cst_66 {dimension_numbers = #tpu.dot_dimension_numbers<[1], [0], [0], [1], [0, 0, 1, 1], [], []>} : vector<2x50xbf16>, vector<50x2xbf16>, vector<2x2xf32> -> vector<2x2xf32>
    %cst_67 = arith.constant 4.000000e-02 : f32
    %178 = vector.broadcast %cst_67 : f32 to vector<2x2xf32>
    %179 = arith.mulf %177, %178 : vector<2x2xf32>
    %180 = arith.truncf %179 : vector<2x2xf32> to vector<2x2xbf16>
    %cst_68 = arith.constant dense<0.000000e+00> : vector<2x50xf32>
    %181 = tpu.matmul %180, %44, %cst_68 {dimension_numbers = #tpu.dot_dimension_numbers<[1], [0], [0], [1], [0, 0, 1, 1], [], []>} : vector<2x2xbf16>, vector<2x50xbf16>, vector<2x50xf32> -> vector<2x50xf32>
    %182 = arith.subf %175, %181 : vector<2x50xf32>
    %183 = arith.mulf %182, %182 : vector<2x50xf32>
    %184 = arith.truncf %183 : vector<2x50xf32> to vector<2x50xbf16>
    %cst_69 = arith.constant dense<0.000000e+00> : vector<2x2xf32>
    %185 = tpu.matmul %184, %29, %cst_69 {dimension_numbers = #tpu.dot_dimension_numbers<[1], [0], [0], [1], [0, 0, 1, 1], [], []>} : vector<2x50xbf16>, vector<50x2xbf16>, vector<2x2xf32> -> vector<2x2xf32>
    %cst_70 = arith.constant 0.0416666679 : f32
    %186 = vector.broadcast %cst_70 : f32 to vector<2x2xf32>
    %187 = arith.mulf %185, %186 : vector<2x2xf32>
    %188 = math.sqrt %187 : vector<2x2xf32>
    %cst_71 = arith.constant 9.99999997E-7 : f32
    %189 = vector.broadcast %cst_71 : f32 to vector<2x2xf32>
    %190 = arith.addf %188, %189 : vector<2x2xf32>
    %191 = tpu.reciprocal %190 {approx = true} : vector<2x2xf32> -> vector<2x2xf32>
    %192 = vector.broadcast %58 : vector<1x50xf32> to vector<2x50xf32>
    %193 = arith.mulf %192, %182 : vector<2x50xf32>
    %194 = arith.truncf %191 : vector<2x2xf32> to vector<2x2xbf16>
    %cst_72 = arith.constant dense<0.000000e+00> : vector<2x50xf32>
    %195 = tpu.matmul %194, %44, %cst_72 {dimension_numbers = #tpu.dot_dimension_numbers<[1], [0], [0], [1], [0, 0, 1, 1], [], []>} : vector<2x2xbf16>, vector<2x50xbf16>, vector<2x50xf32> -> vector<2x50xf32>
    %196 = arith.mulf %193, %195 : vector<2x50xf32>
    %197 = vector.broadcast %59 : vector<1x50xf32> to vector<2x50xf32>
    %198 = arith.addf %196, %197 : vector<2x50xf32>
    %199 = arith.mulf %198, %198 : vector<2x50xf32>
    %cst_73 = arith.constant dense<0.000000e+00> : vector<2xf32>
    %200 = vector.multi_reduction <add>, %199, %cst_73 [1] : vector<2x50xf32> to vector<2xf32>
    %201 = vector.shape_cast %200 : vector<2xf32> to vector<2x1xf32>
    %cst_74 = arith.constant 1.000000e-24 : f32
    %202 = vector.broadcast %cst_74 : f32 to vector<2x1xf32>
    %203 = arith.maximumf %201, %202 : vector<2x1xf32>
    %204 = math.rsqrt %203 : vector<2x1xf32>
    %205 = vector.broadcast %204 : vector<2x1xf32> to vector<2x50xf32>
    %206 = arith.mulf %198, %205 : vector<2x50xf32>
    %207 = arith.truncf %206 : vector<2x50xf32> to vector<2x50xbf16>
    %cst_75 = arith.constant dense<0.000000e+00> : vector<8x50xf32>
    %208 = tpu.matmul %14, %207, %cst_75 {dimension_numbers = #tpu.dot_dimension_numbers<[1], [0], [0], [1], [0, 0, 1, 1], [], []>} : vector<8x2xbf16>, vector<2x50xbf16>, vector<8x50xf32> -> vector<8x50xf32>
    %209 = arith.truncf %208 : vector<8x50xf32> to vector<8x50xbf16>
    %cst_76 = arith.constant dense<0.000000e+00> : vector<8x50xf32>
    %210 = tpu.matmul %209, %49, %cst_76 {dimension_numbers = #tpu.dot_dimension_numbers<[1], [0], [0], [1], [0, 0, 1, 1], [], []>} : vector<8x50xbf16>, vector<50x50xbf16>, vector<8x50xf32> -> vector<8x50xf32>
    %211 = vector.extract_strided_slice %210 {offsets = [0, 0], sizes = [8, 8], strides = [1, 1]} : vector<8x50xf32> to vector<8x8xf32>
    %212 = vector.broadcast %60 : vector<1x8xf32> to vector<8x8xf32>
    %213 = arith.addf %211, %212 : vector<8x8xf32>
    %214 = arith.addf %213, %51 : vector<8x8xf32>
    %cst_77 = arith.constant dense<0xFF800000> : vector<8xf32>
    %215 = vector.multi_reduction <maximumf>, %214, %cst_77 [1] : vector<8x8xf32> to vector<8xf32>
    %216 = vector.shape_cast %215 : vector<8xf32> to vector<8x1xf32>
    %217 = vector.broadcast %216 : vector<8x1xf32> to vector<8x8xf32>
    %218 = arith.subf %214, %217 : vector<8x8xf32>
    %219 = math.exp %218 : vector<8x8xf32>
    %cst_78 = arith.constant dense<0.000000e+00> : vector<8xf32>
    %220 = vector.multi_reduction <add>, %219, %cst_78 [1] : vector<8x8xf32> to vector<8xf32>
    %221 = vector.shape_cast %220 : vector<8xf32> to vector<8x1xf32>
    %222 = tpu.reciprocal %221 {approx = true} : vector<8x1xf32> -> vector<8x1xf32>
    %223 = vector.broadcast %222 : vector<8x1xf32> to vector<8x8xf32>
    %224 = arith.mulf %219, %223 : vector<8x8xf32>
    %225 = vector.extract_strided_slice %224 {offsets = [0, 0], sizes = [4, 8], strides = [1, 1]} : vector<8x8xf32> to vector<4x8xf32>
    %cst_79 = arith.constant dense<0.000000e+00> : vector<8xf32>
    %226 = vector.multi_reduction <add>, %225, %cst_79 [0] : vector<4x8xf32> to vector<8xf32>
    %227 = vector.shape_cast %226 : vector<8xf32> to vector<1x8xf32>
    %228 = vector.extract_strided_slice %224 {offsets = [4, 0], sizes = [4, 8], strides = [1, 1]} : vector<8x8xf32> to vector<4x8xf32>
    %cst_80 = arith.constant dense<0.000000e+00> : vector<8xf32>
    %229 = vector.multi_reduction <add>, %228, %cst_80 [0] : vector<4x8xf32> to vector<8xf32>
    %230 = vector.shape_cast %229 : vector<8xf32> to vector<1x8xf32>
    %231 = tpu.concatenate %227, %230 in 0 : vector<1x8xf32>, vector<1x8xf32> -> vector<2x8xf32>
    %232 = tpu.concatenate %206, %231 in 1 : vector<2x50xf32>, vector<2x8xf32> -> vector<2x58xf32>
    %c0_81 = arith.constant 0 : index
    %c0_82 = arith.constant 0 : index
    %233 = vector.load %arg5[%c0_81, %c0_82] : memref<2x58xf32, #tpu.memory_space<vmem>>, vector<2x58xf32>
    tpu.vector_store %arg5[%c0_81, %c0_82], %232 {strides = array<i32>} : memref<2x58xf32, #tpu.memory_space<vmem>>, vector<2x58xf32>,
    return
  }
}

</mosaic_0001>

<bundles_post_ra>
// kernel: temporal_transformer_forward.1
= control target key start
LH: loop header
LB: loop body
LE: loop exit
PB: predicated region body
PF: predicated region fallthrough
CT: control target
= control target key end

     0   :  { %vm4701_vm0 = vcmask 64512   ;;  %vm4703_vm1 = vcmask 1043456   ;;  %vm4704_vm2 = vmmov 0   ;;  %vm1430_vm3 = vcmask 1041408   ;;  %s4695_s2 = inlined_call_operand.vmem [shape: bf16[648,261], index: 2, kind: input, shape index: {}]   ;;  %s4696_s0 = inlined_call_operand.vmem [shape: f32[8,648], index: 0, kind: input, shape index: {}]   ;;  %s4697_s3 = inlined_call_operand.vmem [shape: bf16[1232,50], index: 3, kind: input, shape index: {}]   ;;  %s4698_s4 = inlined_call_operand.vmem [shape: f32[25,261], index: 4, kind: input, shape index: {}]   ;;  %s4699_s1 = inlined_call_operand.vmem [shape: f32[2,768], index: 1, kind: input, shape index: {}]   ;;  %s4700_s5 = inlined_call_operand.vmem [shape: f32[2,58], index: 5, kind: output, shape index: {}]  }
   0x1   :  { %v3480_v0 = vld [vmem:[%s4695_s2 + $0x4] ss:$12 sps:$4 sm:$0xff]   ;;  %v3482_v1 = vld [vmem:[%s4695_s2] ss:$12 sps:$4 sm:$0xff]   ;;  %v3483_v2 = vld [vmem:[%s4695_s2 + $0x1c] ss:$12 sps:$4 sm:$0xff]  }
   0x2   :  { %1078 = vmatprep.subr.bf16.mxu0 %v3480_v0  ;;  %v3485_v3 = vld [vmem:[%s4695_s2 + $0x18] ss:$12 sps:$4 sm:$0xff]   ;;  %v3486_v4 = vld [vmem:[%s4695_s2 + $0x34] ss:$12 sps:$4 sm:$0xff]   ;;  %v3488_v5 = vld [vmem:[%s4695_s2 + $0x30] ss:$12 sps:$4 sm:$0xff]  }
   0x3   :  { %1079 = vmatpush1.bf16.msra.mxu0 %v3482_v1  ;;  %v3492_v6 = vld [vmem:[%s4695_s2 + $0xc8] ss:$12 sps:$4 sm:$0xff]   ;;  %v3489_v8 = vld [vmem:[%s4695_s2 + $0x4c] ss:$12 sps:$4 sm:$0xff]   ;;  %v3494_v12 = vld [vmem:[%s4695_s2 + $0x64] ss:$12 sps:$4 sm:$0xff]  }
   0x4   :  { %1080 = vmatprep.subr.bf16.mxu0 %v3483_v2  ;;  %v3493_v7 = vld [vmem:[%s4695_s2 + $0x8] ss:$12 sps:$4 sm:$0xff]   ;;  %3131 = vmatprep.subr.bf16.mxu1 %v3492_v6  ;;  %v3497_v9 = vld [vmem:[%s4695_s2 + $0xe0] ss:$12 sps:$4 sm:$0xff]   ;;  %v3502_v13 = vld [vmem:[%s4695_s2 + $0xf8] ss:$12 sps:$4 sm:$0xff]  }
   0x5   :  { %3132 = vmatpush3.bf16.msra.mxu1 %v3493_v7  ;;  %v3498_v10 = vld [vmem:[%s4695_s2 + $0x20] ss:$12 sps:$4 sm:$0xff]   ;;  %v3491_v11 = vld [vmem:[%s4695_s2 + $0x48] ss:$12 sps:$4 sm:$0xff]   ;;  %v3503_v14 = vld [vmem:[%s4695_s2 + $0x38] ss:$12 sps:$4 sm:$0xff]  }
   0x6   :  { %3133 = vmatprep.subr.bf16.mxu1 %v3497_v9  ;;  %v3496_v15 = vld [vmem:[%s4695_s2 + $0x60] ss:$12 sps:$4 sm:$0xff]   ;;  %v3499_v16 = vld [vmem:[%s4695_s2 + $0x7c] ss:$12 sps:$4 sm:$0xff]   ;;  %v3501_v19 = vld [vmem:[%s4695_s2 + $0x78] ss:$12 sps:$4 sm:$0xff]  }
   0x7   :  { %1081 = vmatpush1.bf16.msra.mxu0 %v3485_v3  ;;  %v3507_v17 = vld [vmem:[%s4695_s2 + $0x110] ss:$12 sps:$4 sm:$0xff]   ;;  %v3512_v20 = vld [vmem:[%s4695_s2 + $0x128] ss:$12 sps:$4 sm:$0xff]   ;;  %v3517_v23 = vld [vmem:[%s4695_s2 + $0x140] ss:$12 sps:$4 sm:$0xff]  }
   0x8   :  { %1082 = vmatprep.subr.bf16.mxu0 %v3486_v4  ;;  %v3508_v18 = vld [vmem:[%s4695_s2 + $0x50] ss:$12 sps:$4 sm:$0xff]   ;;  %v3504_v21 = vld [vmem:[%s4695_s2 + $0x94] ss:$12 sps:$4 sm:$0xff]   ;;  %v3509_v25 = vld [vmem:[%s4695_s2 + $0xac] ss:$12 sps:$4 sm:$0xff]  }
   0x9   :  { %3134 = vmatpush3.bf16.msra.mxu1 %v3498_v10  ;;  %v3513_v22 = vld [vmem:[%s4695_s2 + $0x68] ss:$12 sps:$4 sm:$0xff]   ;;  %v3506_v24 = vld [vmem:[%s4695_s2 + $0x90] ss:$12 sps:$4 sm:$0xff]   ;;  %v3518_v26 = vld [vmem:[%s4695_s2 + $0x80] ss:$12 sps:$4 sm:$0xff]  }
   0xa   :  { %3135 = vmatprep.subr.bf16.mxu1 %v3502_v13  ;;  %v3522_v27 = vld [vmem:[%s4695_s2 + $0x158] ss:$12 sps:$4 sm:$0xff]   ;;  %v3511_v28 = vld [vmem:[%s4695_s2 + $0xa8] ss:$12 sps:$4 sm:$0xff]   ;;  %v3527_v31 = vld [vmem:[%s4695_s2 + $0x170] ss:$12 sps:$4 sm:$0xff]  }
   0xb   :  { %1083 = vmatpush1.bf16.msra.mxu0 %v3488_v5  ;;  %v3514_v29 = vld [vmem:[%s4695_s2 + $0xc4] ss:$12 sps:$4 sm:$0xff]   ;;  %v3516_v32 = vld [vmem:[%s4695_s2 + $0xc0] ss:$12 sps:$4 sm:$0xff]   ;;  %v3519_v33 = vld [vmem:[%s4695_s2 + $0xdc] ss:$12 sps:$4 sm:$0xff]  }
   0xc   :  { %1084 = vmatprep.subr.bf16.mxu0 %v3489_v8  ;;  %v3523_v30 = vld [vmem:[%s4695_s2 + $0x98] ss:$12 sps:$4 sm:$0xff]   ;;  %v243_v34 = vld [vmem:[%s4696_s0 + $0x8] sm:$0xff]  ;;  %v3528_v35 = vld [vmem:[%s4695_s2 + $0xb0] ss:$12 sps:$4 sm:$0xff]   ;;  %vm1431_vm4 = vcmask 1042432  }
   0xd   :  { %3136 = vmatpush3.bf16.msra.mxu1 %v3503_v14  ;;  %v411_v36 = vpack.c.bf16 %v243_v34, %v243_v34  ;;  %v242_v37 = vld [vmem:[%s4696_s0] sm:$0xff]  ;;  %v3532_v38 = vld [vmem:[%s4695_s2 + $0x248] ss:$12 sps:$4 sm:$0xff]   ;;  %v3526_v44 = vld [vmem:[%s4695_s2 + $0xf0] ss:$12 sps:$4 sm:$0xff]   ;;  %v3743_v14 = vmov 0  }
   0xe   :  { %3137 = vmatprep.subr.bf16.mxu1 %v3507_v17  ;;  %v3521_v39 = vld [vmem:[%s4695_s2 + $0xd8] ss:$12 sps:$4 sm:$0xff]   ;;  %v3524_v40 = vld [vmem:[%s4695_s2 + $0xf4] ss:$12 sps:$4 sm:$0xff]   ;;  %v3900_v41 = vpack.c.bf16 %v242_v37, %v242_v37  ;;  %v3547_v51 = vld [vmem:[%s4695_s2 + $0x290] ss:$12 sps:$4 sm:$0xff]  }
   0xf   :  { %1085 = vmatpush1.bf16.msra.mxu0 %v3491_v11  ;;  %1233 = vmatprep.mubr.bf16.mxu1 %v411_v36  ;;  %v3533_v42 = vld [vmem:[%s4695_s2 + $0x188] ss:$12 sps:$4 sm:$0xff]   ;;  %v3537_v43 = vld [vmem:[%s4695_s2 + $0x260] ss:$12 sps:$4 sm:$0xff]   ;;  %v3542_v47 = vld [vmem:[%s4695_s2 + $0x278] ss:$12 sps:$4 sm:$0xff]  }
  0x10   :  { %1086 = vmatprep.subr.bf16.mxu0 %v3494_v12  ;;  %1110 = vmatprep.mubr.bf16.mxu0 %v411_v36  ;;  %v3529_v45 = vld [vmem:[%s4695_s2 + $0x10c] ss:$12 sps:$4 sm:$0xff]   ;;  %v3531_v48 = vld [vmem:[%s4695_s2 + $0x108] ss:$12 sps:$4 sm:$0xff]   ;;  %v3534_v49 = vld [vmem:[%s4695_s2 + $0x124] ss:$12 sps:$4 sm:$0xff]  }
  0x11   :  { %3138 = vmatpush3.bf16.msra.mxu1 %v3508_v18  ;;  %v3538_v46 = vld [vmem:[%s4695_s2 + $0x1a0] ss:$12 sps:$4 sm:$0xff]   ;;  %v3543_v50 = vld [vmem:[%s4695_s2 + $0x1b8] ss:$12 sps:$4 sm:$0xff]   ;;  %v3539_v53 = vld [vmem:[%s4695_s2 + $0x13c] ss:$12 sps:$4 sm:$0xff]  }
  0x12   :  { %3139 = vmatprep.subr.bf16.mxu1 %v3512_v20  ;;  %v3536_v52 = vld [vmem:[%s4695_s2 + $0x120] ss:$12 sps:$4 sm:$0xff]   ;;  %v3548_v54 = vld [vmem:[%s4695_s2 + $0x1d0] ss:$12 sps:$4 sm:$0xff]   ;;  %v3552_v55 = vld [vmem:[%s4695_s2 + $0x2a8] ss:$12 sps:$4 sm:$0xff]  }
  0x13   :  { %1087 = vmatpush1.bf16.msra.mxu0 %v3496_v15  ;;  %v3541_v56 = vld [vmem:[%s4695_s2 + $0x138] ss:$12 sps:$4 sm:$0xff]   ;;  %v3544_v57 = vld [vmem:[%s4695_s2 + $0x154] ss:$12 sps:$4 sm:$0xff]   ;;  %v3546_v60 = vld [vmem:[%s4695_s2 + $0x150] ss:$12 sps:$4 sm:$0xff]  }
  0x14   :  { %1088 = vmatprep.subr.bf16.mxu0 %v3499_v16  ;;  %v3553_v58 = vld [vmem:[%s4695_s2 + $0x1e8] ss:$12 sps:$4 sm:$0xff]   ;;  %v3557_v59 = vld [vmem:[%s4695_s2 + $0x2c0] ss:$12 sps:$4 sm:$0xff]   ;;  %v3562_v63 = vld [vmem:[%s4695_s2 + $0x2d8] ss:$12 sps:$4 sm:$0xff]  }
  0x15   :  { %3140 = vmatpush3.bf16.msra.mxu1 %v3513_v22  ;;  %v3549_v61 = vld [vmem:[%s4695_s2 + $0x16c] ss:$12 sps:$4 sm:$0xff]   ;;  %v3551_v0 = vld [vmem:[%s4695_s2 + $0x168] ss:$12 sps:$4 sm:$0xff]   ;;  %v3556_v2 = vld [vmem:[%s4695_s2 + $0x184] ss:$12 sps:$4 sm:$0xff]  }
  0x16   :  { %3141 = vmatprep.subr.bf16.mxu1 %v3517_v23  ;;  %v3558_v62 = vld [vmem:[%s4695_s2 + $0x200] ss:$12 sps:$4 sm:$0xff]   ;;  %v245_v1 = vld [vmem:[%s4696_s0 + $0x18] sm:$0xff]  ;;  %v244_v9 = vld [vmem:[%s4696_s0 + $0x10] sm:$0xff]  ;;  %vm1426_vm5 = vcmask 39936   ;;  %vm1518_vm6 = vcmask 408576  }
  0x17   :  { %1089 = vmatpush1.bf16.msra.mxu0 %v3501_v19  ;;  %v413_v3 = vpack.c.bf16 %v245_v1, %v245_v1  ;;  %v3563_v4 = vld [vmem:[%s4695_s2 + $0x218] ss:$12 sps:$4 sm:$0xff]   ;;  %v3567_v5 = vld [vmem:[%s4695_s2 + $0x2f0] ss:$12 sps:$4 sm:$0xff]   ;;  %v3554_v6 = vld [vmem:[%s4695_s2 + $0x180] ss:$12 sps:$4 sm:$0xff]   ;;  %v4003_v12 = vpack.c.bf16 %v244_v9, %v244_v9 }
  0x18   :  { %1090 = vmatprep.subr.bf16.mxu0 %v3504_v21  ;;  %v3561_v7 = vld [vmem:[%s4695_s2 + $0x19c] ss:$12 sps:$4 sm:$0xff]   ;;  %v3559_v10 = vld [vmem:[%s4695_s2 + $0x198] ss:$12 sps:$4 sm:$0xff]   ;;  %v3566_v11 = vld [vmem:[%s4695_s2 + $0x1b4] ss:$12 sps:$4 sm:$0xff]  }
  0x19   :  { %3142 = vmatpush3.bf16.msra.mxu1 %v3518_v26  ;;  %v3568_v8 = vld [vmem:[%s4695_s2 + $0x230] ss:$12 sps:$4 sm:$0xff]   ;;  %v3572_v13 = vld [vmem:[%s4695_s2 + $0x308] ss:$12 sps:$4 sm:$0xff]   ;;  %v3571_v16 = vld [vmem:[%s4695_s2 + $0x1cc] ss:$12 sps:$4 sm:$0xff]  }
  0x1a   :  { %3143 = vmatprep.subr.bf16.mxu1 %v3522_v27  ;;  %v3564_v15 = vld [vmem:[%s4695_s2 + $0x1b0] ss:$12 sps:$4 sm:$0xff]   ;;  %v3576_v17 = vld [vmem:[%s4695_s2 + $0x320] ss:$12 sps:$4 sm:$0xff]   ;;  %v3569_v18 = vld [vmem:[%s4695_s2 + $0x1c8] ss:$12 sps:$4 sm:$0xff]  }
  0x1b   :  { %1091 = vmatpush1.bf16.msra.mxu0 %v3506_v24  ;;  %v3575_v19 = vld [vmem:[%s4695_s2 + $0x1e4] ss:$12 sps:$4 sm:$0xff]   ;;  %v3573_v21 = vld [vmem:[%s4695_s2 + $0x1e0] ss:$12 sps:$4 sm:$0xff]   ;;  %v3579_v22 = vld [vmem:[%s4695_s2 + $0x1fc] ss:$12 sps:$4 sm:$0xff]  }
  0x1c   :  { %1092 = vmatprep.subr.bf16.mxu0 %v3509_v25  ;;  %v3580_v20 = vld [vmem:[%s4695_s2 + $0x338] ss:$12 sps:$4 sm:$0xff]   ;;  %v247_v23 = vld [vmem:[%s4696_s0 + $0x28] sm:$0xff]  ;;  %v3584_v24 = vld [vmem:[%s4695_s2 + $0x350] ss:$12 sps:$4 sm:$0xff]   ;;  %vm1995_vm10 = vcmask 1040384  }
  0x1d   :  { %3144 = vmatpush3.bf16.msra.mxu1 %v3523_v30  ;;  %v4042_v25 = vpack.c.bf16 %v247_v23, %v247_v23  ;;  %v3577_v26 = vld [vmem:[%s4695_s2 + $0x1f8] ss:$12 sps:$4 sm:$0xff]   ;;  %v3583_v27 = vld [vmem:[%s4695_s2 + $0x214] ss:$12 sps:$4 sm:$0xff]   ;;  %v3595_v36 = vld [vmem:[%s4695_s2 + $0x25c] ss:$12 sps:$4 sm:$0xff]  }
  0x1e   :  { %3145 = vmatprep.subr.bf16.mxu1 %v3527_v31  ;;  %v3587_v30 = vld [vmem:[%s4695_s2 + $0x22c] ss:$12 sps:$4 sm:$0xff]   ;;  %v3600_v37 = vld [vmem:[%s4695_s2 + $0x3b0] ss:$12 sps:$4 sm:$0xff]   ;;  %vm4702_vm11 = vcmask 15360  }
  0x1f   :  { %1093 = vmatpush1.bf16.msra.mxu0 %v3511_v28  ;;  %v3588_v28 = vld [vmem:[%s4695_s2 + $0x368] ss:$12 sps:$4 sm:$0xff]   ;;  %v3592_v31 = vld [vmem:[%s4695_s2 + $0x380] ss:$12 sps:$4 sm:$0xff]   ;;  %v3596_v34 = vld [vmem:[%s4695_s2 + $0x398] ss:$12 sps:$4 sm:$0xff]  }
  0x20   :  { %1094 = vmatprep.subr.bf16.mxu0 %v3514_v29  ;;  %v3581_v29 = vld [vmem:[%s4695_s2 + $0x210] ss:$12 sps:$4 sm:$0xff]  }
  0x21   :  { %3146 = vmatpush3.bf16.msra.mxu1 %v3528_v35  ;;  %v3589_v35 = vld [vmem:[%s4695_s2 + $0x240] ss:$12 sps:$4 sm:$0xff]   ;;  %v3634_v1 = vld [vmem:[%s4695_s2 + $0x37c] ss:$12 sps:$4 sm:$0xff]   ;;  %v3655_v23 = vld [vmem:[%s4697_s3 + $0x70] sm:$0xff]  }
  0x22   :  { %3153 = vmatprep.subr.bf16.mxu1 %v3532_v38  ;;  %v3604_v38 = vld [vmem:[%s4695_s2 + $0x3c8] ss:$0 sps:$4 sm:$0xff]  }
  0x23   :  { %1095 = vmatpush1.bf16.msra.mxu0 %v3516_v32  ;;  %v3585_v32 = vld [vmem:[%s4695_s2 + $0x228] ss:$12 sps:$4 sm:$0xff]  }
  0x24   :  { %1096 = vmatprep.subr.bf16.mxu0 %v3519_v33  ;;  %1234 = vmatmul.mubr.bf16.vlgmr.msra.gmra.mrb[0].mxu1 %v3900_v41  ;;  %v3591_v33 = vld [vmem:[%s4695_s2 + $0x244] ss:$12 sps:$4 sm:$0xff]  }
  0x25   :  { %3154 = vmatpush3.bf16.msra.mxu1 %v3533_v42  ;;  %1273 = vmatprep.mubr.bf16.mxu1 %v413_v3  ;;  %v1076_v42 = vsel %vm4703_vm1, %v3604_v38, 0 }
  0x26   :  { %3155 = vmatprep.subr.bf16.mxu1 %v3537_v43  ;;  %v3597_v43 = vld [vmem:[%s4695_s2 + $0x270] ss:$12 sps:$4 sm:$0xff]  }
  0x27   :  { %1097 = vmatpush1.bf16.msra.mxu0 %v3521_v39  ;;  %v3593_v39 = vld [vmem:[%s4695_s2 + $0x258] ss:$12 sps:$4 sm:$0xff]  }
  0x28   :  { %1098 = vmatprep.subr.bf16.mxu0 %v3524_v40  ;;  %v3599_v40 = vld [vmem:[%s4695_s2 + $0x274] ss:$12 sps:$4 sm:$0xff]  }
  0x29   :  { %3156 = vmatpush3.bf16.msra.mxu1 %v3538_v46  ;;  %v3601_v46 = vld [vmem:[%s4695_s2 + $0x288] ss:$12 sps:$4 sm:$0xff]  }
  0x2a   :  { %3157 = vmatprep.subr.bf16.mxu1 %v3542_v47  ;;  %v3607_v47 = vld [vmem:[%s4695_s2 + $0x2a4] ss:$12 sps:$4 sm:$0xff]  }
  0x2b   :  { %1099 = vmatpush1.bf16.msra.mxu0 %v3526_v44  ;;  %v3603_v44 = vld [vmem:[%s4695_s2 + $0x28c] ss:$12 sps:$4 sm:$0xff]  }
  0x2c   :  { %1100 = vmatprep.subr.bf16.mxu0 %v3529_v45 }
  0x2d   :  { %3158 = vmatpush3.bf16.msra.mxu1 %v3543_v50  ;;  %v3608_v50 = vld [vmem:[%s4695_s2 + $0x2b8] ss:$12 sps:$4 sm:$0xff]  }
  0x2e   :  { %3159 = vmatprep.subr.bf16.mxu1 %v3547_v51  ;;  %v3613_v51 = vld [vmem:[%s4695_s2 + $0x2d4] ss:$12 sps:$4 sm:$0xff]  }
  0x2f   :  { %1101 = vmatpush1.bf16.msra.mxu0 %v3531_v48  ;;  %v3605_v48 = vld [vmem:[%s4695_s2 + $0x2a0] ss:$12 sps:$4 sm:$0xff]  }
  0x30   :  { %1102 = vmatprep.subr.bf16.mxu0 %v3534_v49  ;;  %v3610_v49 = vld [vmem:[%s4695_s2 + $0x2bc] ss:$12 sps:$4 sm:$0xff]  }
  0x31   :  { %3160 = vmatpush3.bf16.msra.mxu1 %v3548_v54  ;;  %v3614_v54 = vld [vmem:[%s4695_s2 + $0x2e8] ss:$12 sps:$4 sm:$0xff]  }
  0x32   :  { %3161 = vmatprep.subr.bf16.mxu1 %v3552_v55  ;;  %v3619_v55 = vld [vmem:[%s4695_s2 + $0x304] ss:$12 sps:$4 sm:$0xff]  }
  0x33   :  { %1103 = vmatpush1.bf16.msra.mxu0 %v3536_v52  ;;  %v3611_v52 = vld [vmem:[%s4695_s2 + $0x2d0] ss:$12 sps:$4 sm:$0xff]  }
  0x34   :  { %1104 = vmatprep.subr.bf16.mxu0 %v3539_v53  ;;  %v3616_v53 = vld [vmem:[%s4695_s2 + $0x2ec] ss:$12 sps:$4 sm:$0xff]  }
  0x35   :  { %3162 = vmatpush3.bf16.msra.mxu1 %v3553_v58  ;;  %v3620_v58 = vld [vmem:[%s4695_s2 + $0x318] ss:$12 sps:$4 sm:$0xff]  }
  0x36   :  { %3163 = vmatprep.subr.bf16.mxu1 %v3557_v59  ;;  %v3625_v59 = vld [vmem:[%s4695_s2 + $0x334] ss:$12 sps:$4 sm:$0xff]  }
  0x37   :  { %1105 = vmatpush1.bf16.msra.mxu0 %v3541_v56  ;;  %v3617_v56 = vld [vmem:[%s4695_s2 + $0x300] ss:$12 sps:$4 sm:$0xff]  }
  0x38   :  { %1106 = vmatprep.subr.bf16.mxu0 %v3544_v57  ;;  %v3622_v57 = vld [vmem:[%s4695_s2 + $0x31c] ss:$12 sps:$4 sm:$0xff]  }
  0x39   :  { %3164 = vmatpush3.bf16.msra.mxu1 %v3558_v62  ;;  %v3626_v62 = vld [vmem:[%s4695_s2 + $0x348] ss:$12 sps:$4 sm:$0xff]  }
  0x3a   :  { %3165 = vmatprep.subr.bf16.mxu1 %v3562_v63  ;;  %v3631_v63 = vld [vmem:[%s4695_s2 + $0x364] ss:$12 sps:$4 sm:$0xff]  }
  0x3b   :  { %1107 = vmatpush1.bf16.msra.mxu0 %v3546_v60  ;;  %v3623_v60 = vld [vmem:[%s4695_s2 + $0x330] ss:$12 sps:$4 sm:$0xff]  }
  0x3c   :  { %1108 = vmatprep.subr.bf16.mxu0 %v3549_v61  ;;  %v3628_v61 = vld [vmem:[%s4695_s2 + $0x34c] ss:$12 sps:$4 sm:$0xff]  }
  0x3d   :  { %3166 = vmatpush3.bf16.msra.mxu1 %v3563_v4  ;;  %v3635_v4 = vld [vmem:[%s4695_s2 + $0x390] ss:$12 sps:$4 sm:$0xff]  }
  0x3e   :  { %3167 = vmatprep.subr.bf16.mxu1 %v3567_v5  ;;  %v3640_v5 = vld [vmem:[%s4695_s2 + $0x3ac] ss:$12 sps:$4 sm:$0xff]  }
  0x3f   :  { %1109 = vmatpush1.bf16.msra.mxu0 %v3551_v0  ;;  %v3629_v0 = vld [vmem:[%s4695_s2 + $0x360] ss:$12 sps:$4 sm:$0xff]  }
  0x40   :  { %1119 = vmatprep.subr.bf16.mxu0 %v3556_v2  ;;  %v3632_v2 = vld [vmem:[%s4695_s2 + $0x378] ss:$12 sps:$4 sm:$0xff]  }
  0x41   :  { %3168 = vmatpush3.bf16.msra.mxu1 %v3568_v8 }
  0x42   :  { %1111 = vmatmul.mubr.bf16.vlgmr.msra.gmra.mrb[0].mxu0 %v3900_v41  ;;  %1281 = vmatprep.subr.bf16.mxu1 %v3743_v14  ;;  %v246_v41 = vld [vmem:[%s4696_s0 + $0x20] sm:$0xff] }
  0x43   :  { %1120 = vmatpush1.bf16.msra.mxu0 %v3554_v6  ;;  %1151 = vmatprep.mubr.bf16.mxu0 %v413_v3  ;;  %v414_v45 = vpack.c.bf16 %v246_v41, %v246_v41  ;;  %v3637_v3 = vld [vmem:[%s4695_s2 + $0x394] ss:$12 sps:$4 sm:$0xff]   ;;  %v3676_v41 = vld [vmem:[%s4697_s3 + $0x148] sm:$0xff]  }
  0x44   :  { %1121 = vmatprep.subr.bf16.mxu0 %v3561_v7  ;;  %1274 = vmatmul.mubr.bf16.vlgmr.msra.gmra.mrb[4].mxu1 %v4003_v12  ;;  %v408_v6 = vld [vmem:[%s4695_s2 + $0x3c0] sm:$0xff]  ;;  %v3638_v7 = vld [vmem:[%s4695_s2 + $0x3a8] ss:$12 sps:$4 sm:$0xff]  }
  0x45   :  { %1282 = vmatpush1.bf16.msra.mxu1 %v3572_v13  ;;  %3006 = vmatprep.mubr.msk.bf16.mxu1 %vm4701_vm0, %v4042_v25  ;;  %v3002_v8 = vcombine.high %v408_v6, %v408_v6  ;;  %v3001_v9 = vcombine.low %v408_v6, %v408_v6  ;;  %v3645_v13 = vld [vmem:[%s4697_s3 + $0x48] sm:$0xff]  }
  0x46   :  { %1283 = vmatprep.subr.bf16.mxu1 %v3743_v14 }
  0x47   :  { %1122 = vmatpush1.bf16.msra.mxu0 %v3559_v10  ;;  %v1070_v10 = vsel %vm4703_vm1, %v3001_v9, 0 }
  0x48   :  { %1123 = vmatprep.subr.bf16.mxu0 %v3566_v11  ;;  %v3643_v11 = vld [vmem:[%s4697_s3 + $0x40] sm:$0xff]  }
  0x49   :  { %1284 = vmatpush1.bf16.msra.mxu1 %v3576_v17  ;;  %v3649_v17 = vld [vmem:[%s4697_s3 + $0x58] sm:$0xff]  }
  0x4a   :  { %1285 = vmatprep.subr.bf16.mxu1 %v3743_v14 }
  0x4b   :  { %1124 = vmatpush1.bf16.msra.mxu0 %v3564_v15  ;;  %v3647_v15 = vld [vmem:[%s4697_s3 + $0x50] sm:$0xff]  }
  0x4c   :  { %1125 = vmatprep.subr.bf16.mxu0 %v3571_v16  ;;  %v3648_v16 = vld [vmem:[%s4697_s3 + $0x10] sm:$0xff]  }
  0x4d   :  { %1286 = vmatpush1.bf16.msra.mxu1 %v3580_v20  ;;  %v3652_v20 = vld [vmem:[%s4697_s3 + $0x20] sm:$0xff]  }
  0x4e   :  { %1287 = vmatprep.subr.bf16.mxu1 %v3743_v14 }
  0x4f   :  { %1126 = vmatpush1.bf16.msra.mxu0 %v3569_v18  ;;  %v3650_v18 = vld [vmem:[%s4697_s3 + $0x18] sm:$0xff]  }
  0x50   :  { %1127 = vmatprep.subr.bf16.mxu0 %v3575_v19  ;;  %v3651_v19 = vld [vmem:[%s4697_s3 + $0x60] sm:$0xff]  }
  0x51   :  { %1288 = vmatpush1.bf16.msra.mxu1 %v3584_v24  ;;  %v3656_v24 = vld [vmem:[%s4697_s3 + $0x30] sm:$0xff]  }
  0x52   :  { %1289 = vmatprep.subr.bf16.mxu1 %v3743_v14 }
  0x53   :  { %1128 = vmatpush1.bf16.msra.mxu0 %v3573_v21  ;;  %v3653_v21 = vld [vmem:[%s4697_s3 + $0x68] sm:$0xff]  }
  0x54   :  { %1129 = vmatprep.subr.bf16.mxu0 %v3579_v22  ;;  %v3654_v22 = vld [vmem:[%s4697_s3 + $0x28] sm:$0xff]  }
  0x55   :  { %1290 = vmatpush1.bf16.msra.mxu1 %v3588_v28 }
  0x56   :  { %1291 = vmatprep.subr.bf16.mxu1 %v3743_v14 }
  0x57   :  { %1130 = vmatpush1.bf16.msra.mxu0 %v3577_v26 }
  0x58   :  { %1131 = vmatprep.subr.bf16.mxu0 %v3583_v27  ;;  %v3657_v27 = vld [vmem:[%s4697_s3 + $0x78] sm:$0xff]  }
  0x59   :  { %1292 = vmatpush1.bf16.msra.mxu1 %v3592_v31 }
  0x5a   :  { %1293 = vmatprep.subr.bf16.mxu1 %v3743_v14 }
  0x5b   :  { %1132 = vmatpush1.bf16.msra.mxu0 %v3581_v29 }
  0x5c   :  { %1133 = vmatprep.subr.bf16.mxu0 %v3587_v30  ;;  %v3658_v30 = vld [vmem:[%s4697_s3 + $0x38] sm:$0xff]  }
  0x5d   :  { %1294 = vmatpush1.bf16.msra.mxu1 %v3596_v34 }
  0x5e   :  { %1295 = vmatprep.subr.bf16.mxu1 %v3743_v14 }
  0x5f   :  { %1134 = vmatpush1.bf16.msra.mxu0 %v3585_v32  ;;  %v3744_v32 = vmov 0.0  }
  0x60   :  { %1135 = vmatprep.subr.bf16.mxu0 %v3591_v33  ;;  %v231_v33 = vld [vmem:[%s4698_s4 + $0x10] sm:$0xff] }
  0x61   :  { %1296 = vmatpush1.bf16.msra.mxu1 %v3600_v37 }
  0x62   :  { %1297 = vmatprep.subr.bf16.mxu1 %v3743_v14  ;;  %v3646_v14 = vld [vmem:[%s4697_s3 + $0x8] sm:$0xff]  }
  0x63   :  { %1136 = vmatpush1.bf16.msra.mxu0 %v3589_v35 }
  0x64   :  { %1137 = vmatprep.subr.bf16.mxu0 %v3595_v36 }
  0x65   :  { %1298 = vmatpush1.bf16.msra.mxu1 %v1076_v42  ;;  %v3677_v42 = vld [vmem:[%s4697_s3 + $0x108] sm:$0xff]  }
  0x66   :  { %3175 = vmatprep.subr.bf16.mxu1 %v3643_v11  ;;  %v229_v11 = vld [vmem:[%s4698_s4] sm:$0xff] }
  0x67   :  { %1138 = vmatpush1.bf16.msra.mxu0 %v3593_v39 }
  0x68   :  { %1139 = vmatprep.subr.bf16.mxu0 %v3599_v40  ;;  %1314 = vmatmul.mubr.bf16.vlgmr.msra.gmra.mrb[8].mxu1 %v414_v45 }
  0x6b   :  { %1140 = vmatpush1.bf16.msra.mxu0 %v3597_v43  ;;  %v21_v43 = vlaneseq }
  0x6c   :  { %1141 = vmatprep.subr.bf16.mxu0 %v3603_v44  ;;  %v3745_v44 = vmov 1983009808  }
  0x6f   :  { %1142 = vmatpush1.bf16.msra.mxu0 %v3601_v46  ;;  %v4249_v46 = vshrl.u32 %v21_v43, 7 }
  0x70   :  { %1143 = vmatprep.subr.bf16.mxu0 %v3607_v47 }
  0x73   :  { %1144 = vmatpush1.bf16.msra.mxu0 %v3605_v48  ;;  %v1540_v48 = vld [vmem:[%s4699_s1] sm:$0xff] }
  0x74   :  { %1145 = vmatprep.subr.bf16.mxu0 %v3610_v49  ;;  %v3680_v49 = vld [vmem:[%s4697_s3 + $0x150] sm:$0xff]   ;;  %v1544_v6 = vcombine.high %v1540_v48, %v1540_v48 }
  0x77   :  { %1146 = vmatpush1.bf16.msra.mxu0 %v3608_v50  ;;  %v3681_v50 = vld [vmem:[%s4697_s3 + $0x110] sm:$0xff]  }
  0x78   :  { %1147 = vmatprep.subr.bf16.mxu0 %v3613_v51 }
  0x7b   :  { %1148 = vmatpush1.bf16.msra.mxu0 %v3611_v52 }
  0x7c   :  { %1149 = vmatprep.subr.bf16.mxu0 %v3616_v53  ;;  %v3684_v53 = vld [vmem:[%s4697_s3 + $0x158] sm:$0xff]  }
  0x7f   :  { %1150 = vmatpush1.bf16.msra.mxu0 %v3614_v54  ;;  %v3685_v54 = vld [vmem:[%s4697_s3 + $0x118] sm:$0xff]  }
  0x80   :  { %1160 = vmatprep.subr.bf16.mxu0 %v3619_v55  ;;  %v3688_v55 = vld [vmem:[%s4697_s3 + $0x160] sm:$0xff]  }
  0x82   :  { %1152 = vmatmul.mubr.bf16.vlgmr.msra.gmra.mrb[0].mxu0 %v4003_v12  ;;  %v3644_v12 = vld [vmem:[%s4697_s3] sm:$0xff]  }
  0x83   :  { %1161 = vmatpush1.bf16.msra.mxu0 %v3617_v56  ;;  %3005 = vmatprep.mubr.msk.bf16.mxu0 %vm4701_vm0, %v4042_v25  ;;  %v3689_v56 = vld [vmem:[%s4697_s3 + $0x120] sm:$0xff]  }
  0x84   :  { %1162 = vmatprep.subr.bf16.mxu0 %v3622_v57  ;;  %3176 = vmatpush3.bf16.msra.mxu1 %v3644_v12  ;;  %v3692_v57 = vld [vmem:[%s4697_s3 + $0x168] sm:$0xff]  }
  0x85   :  { %3177 = vmatprep.subr.bf16.mxu1 %v3645_v13  ;;  %v230_v12 = vld [vmem:[%s4698_s4 + $0x8] sm:$0xff] }
  0x87   :  { %1163 = vmatpush1.bf16.msra.mxu0 %v3620_v58  ;;  %v3693_v58 = vld [vmem:[%s4697_s3 + $0x128] sm:$0xff]  }
  0x88   :  { %1164 = vmatprep.subr.bf16.mxu0 %v3625_v59  ;;  %3178 = vmatpush3.bf16.msra.mxu1 %v3646_v14  ;;  %v3696_v59 = vld [vmem:[%s4697_s3 + $0x170] sm:$0xff]   ;;  %v3747_v14 = vmov 65535  }
  0x89   :  { %3179 = vmatprep.subr.bf16.mxu1 %v3647_v15  ;;  %v1432_v15 = vsel %vm1430_vm3, 4294967295, %v3747_v14 }
  0x8b   :  { %1165 = vmatpush1.bf16.msra.mxu0 %v3623_v60  ;;  %v3697_v60 = vld [vmem:[%s4697_s3 + $0x130] sm:$0xff]  }
  0x8c   :  { %1166 = vmatprep.subr.bf16.mxu0 %v3628_v61  ;;  %3180 = vmatpush3.bf16.msra.mxu1 %v3648_v16 }
  0x8d   :  { %3181 = vmatprep.subr.bf16.mxu1 %v3649_v17 }
  0x8f   :  { %1167 = vmatpush1.bf16.msra.mxu0 %v3626_v62  ;;  %v3700_v62 = vld [vmem:[%s4697_s3 + $0x178] sm:$0xff]  }
  0x90   :  { %1168 = vmatprep.subr.bf16.mxu0 %v3631_v63  ;;  %3182 = vmatpush3.bf16.msra.mxu1 %v3650_v18  ;;  %v3701_v63 = vld [vmem:[%s4697_s3 + $0x138] sm:$0xff]  }
  0x91   :  { %3183 = vmatprep.subr.bf16.mxu1 %v3651_v19 }
  0x93   :  { %1169 = vmatpush1.bf16.msra.mxu0 %v3629_v0 }
  0x94   :  { %1170 = vmatprep.subr.bf16.mxu0 %v3634_v1  ;;  %3184 = vmatpush3.bf16.msra.mxu1 %v3652_v20  ;;  %v3659_v20 = vld [vmem:[%s4697_s3 + $0x80] ss:$0 sps:$4 sm:$0x77]  }
  0x95   :  { %3185 = vmatprep.subr.bf16.mxu1 %v3653_v21 }
  0x97   :  { %1171 = vmatpush1.bf16.msra.mxu0 %v3632_v2 }
  0x98   :  { %1172 = vmatprep.subr.bf16.mxu0 %v3637_v3  ;;  %3186 = vmatpush3.bf16.msra.mxu1 %v3654_v22 }
  0x99   :  { %3187 = vmatprep.subr.bf16.mxu1 %v3655_v23  ;;  %v1433_v23 = vsel %vm1431_vm4, %v1432_v15, 0 }
  0x9b   :  { %1173 = vmatpush1.bf16.msra.mxu0 %v3635_v4  ;;  %v3704_v4 = vld [vmem:[%s4697_s3 + $0x180] sm:$0xff]  }
  0x9c   :  { %1174 = vmatprep.subr.bf16.mxu0 %v3640_v5  ;;  %3188 = vmatpush3.bf16.msra.mxu1 %v3656_v24  ;;  %v3705_v5 = vld [vmem:[%s4697_s3 + $0x140] sm:$0xff]  }
  0x9d   :  { %3189 = vmatprep.subr.bf16.mxu1 %v3657_v27 }
  0x9f   :  { %1175 = vmatpush1.bf16.msra.mxu0 %v3638_v7 }
  0xa0   :  { %3004 = vmatprep.subr.msk.bf16.mxu0 %vm4703_vm1, %v3002_v8  ;;  %3190 = vmatpush3.bf16.msra.mxu1 %v3658_v30 }
  0xa1   :  { %3319 = vmatprep.subr.bf16.mxu1 %v3744_v32 }
  0xa3   :  { %1177 = vmatpush1.bf16.msra.mxu0 %v1070_v10 }
  0xa4   :  { %3221 = vmatprep.subr.bf16.mxu0 %v3676_v41  ;;  %v3668_v41 = vld [vmem:[%s4697_s3 + $0xe8] sm:$0xff]  }
  0xa6   :  { %1193 = vmatmul.mubr.bf16.vlgmr.msra.gmra.mrb[0].mxu0 %v414_v45  ;;  %v1546_v45 = vunpack.c.l.s4 %v3745_v44  ;;  %v3670_v44 = vld [vmem:[%s4697_s3 + $0xf0] sm:$0xff]  }
  0xa7   :  { %3222 = vmatpush3.bf16.msra.mxu0 %v3677_v42  ;;  %v3669_v42 = vld [vmem:[%s4697_s3 + $0xa8] sm:$0xff]  }
  0xa8   :  { %v1547_v47 = vunpack.c.0.s8 %v1546_v45  ;;  %3223 = vmatprep.subr.bf16.mxu0 %v3680_v49  ;;  %v3671_v45 = vld [vmem:[%s4697_s3 + $0xb0] sm:$0xff]   ;;  %v3674_v49 = vld [vmem:[%s4697_s3 + $0x100] sm:$0xff]  }
  0xaa   :  { %v1550_v51 = vsub.s32 %v1547_v47, %v4249_v46  ;;  %v3672_v47 = vld [vmem:[%s4697_s3 + $0xf8] sm:$0xff]  }
  0xab   :  { %3224 = vmatpush3.bf16.msra.mxu0 %v3681_v50  ;;  %v3025_v50 = vld.sshfl [vmem:[%s4699_s1 + $0x8] sm:$0x33 pattern:$0x76325410] }
  0xac   :  { %v4261_v52 = vrot.slane %v1540_v48, %v1550_v51  ;;  %3225 = vmatprep.subr.bf16.mxu0 %v3684_v53  ;;  %v1558_v7 = vrot.slane %v1544_v6, %v1550_v51  ;;  %v3673_v48 = vld [vmem:[%s4697_s3 + $0xb8] sm:$0xff]   ;;  %v3675_v51 = vld [vmem:[%s4697_s3 + $0xc0] sm:$0xff]   ;;  %v1568_v53 = vcombine.high %v3025_v50, %v3025_v50 }
  0xad   :  { %v3708_v6 = vld [vmem:[%s4697_s3 + $0x1c0] sm:$0xff]  }
  0xae   :  { %v1560_v8 = vcombine.high %v1558_v7, %v1558_v7  ;;  %v1577_v9 = vpack.c.bf16 %v1558_v7, %v1558_v7  ;;  %v1579_v7 = vpack.c.bf16 %v3025_v50, %v3025_v50 }
  0xaf   :  { %3226 = vmatpush3.bf16.msra.mxu0 %v3685_v54  ;;  %v3678_v54 = vld [vmem:[%s4697_s3 + $0x1c8] sm:$0xff]  }
  0xb0   :  { %3227 = vmatprep.subr.bf16.mxu0 %v3688_v55  ;;  %v1578_v10 = vpack.c.bf16 %v1560_v8, %v1560_v8  ;;  %v1575_v55 = vpack.c.bf16 %v4261_v52, %v4261_v52 }
  0xb2   :  { %1941 = vmatprep.mubr.bf16.mxu0 %v1578_v10 }
  0xb3   :  { %3228 = vmatpush3.bf16.msra.mxu0 %v3689_v56  ;;  %v3679_v56 = vld [vmem:[%s4697_s3 + $0x188] sm:$0xff]  }
  0xb4   :  { %3229 = vmatprep.subr.bf16.mxu0 %v3692_v57  ;;  %v1580_v57 = vpack.c.bf16 %v1568_v53, %v1568_v53 }
  0xb7   :  { %3230 = vmatpush3.bf16.msra.mxu0 %v3693_v58  ;;  %v3682_v58 = vld [vmem:[%s4697_s3 + $0x1d0] sm:$0xff]  }
  0xb8   :  { %3231 = vmatprep.subr.bf16.mxu0 %v3696_v59  ;;  %v3683_v59 = vld [vmem:[%s4697_s3 + $0x190] sm:$0xff]  }
  0xbb   :  { %3232 = vmatpush3.bf16.msra.mxu0 %v3697_v60  ;;  %v3687_v60 = vld [vmem:[%s4697_s3 + $0x198] sm:$0xff]  }
  0xbc   :  { %3233 = vmatprep.subr.bf16.mxu0 %v3700_v62  ;;  %v3691_v62 = vld [vmem:[%s4697_s3 + $0x1a0] sm:$0xff]  }
  0xbf   :  { %3234 = vmatpush3.bf16.msra.mxu0 %v3701_v63  ;;  %v3694_v63 = vld [vmem:[%s4697_s3 + $0x1e8] sm:$0xff]  }
  0xc0   :  { %3235 = vmatprep.subr.bf16.mxu0 %v3704_v4  ;;  %v3703_v4 = vld [vmem:[%s4697_s3 + $0x1b8] sm:$0xff]  }
  0xc3   :  { %3236 = vmatpush3.bf16.msra.mxu0 %v3705_v5  ;;  %v3706_v5 = vld [vmem:[%s4697_s3 + $0x200] sm:$0xff]  }
  0xc4   :  { %3331 = vmatprep.subr.bf16.mxu0 %v3744_v32 }
  0xc6   :  { %1942 = vmatmul.mubr.bf16.vlgmr.msra.gmra.mrb[4].mxu0 %v1577_v9 }
  0xc7   :  { %3339 = vmatprep.mubr.msk.bf16.mxu0 %vm4704_vm2, %v3744_v32 }
  0xf7   :  { %v3147_v25 = vpop.f32.mrb[0].mxu1 }
  0xf8   :  { %v3148_v26 = vpop.f32.mrb[1].mxu1 }
  0xf9   :  { %v3149_v28 = vadd.f32 %v3148_v26, %v3147_v25  ;;  %v3150_v29 = vpop.f32.mrb[2].mxu1  ;;  %v1435_v26 = vand.u32 %v3659_v20, %v1433_v23 }
  0xfa   :  { %v3151_v31 = vpop.f32.mrb[3].mxu1  ;;  %v1559_v29 = vcombine.high %v4261_v52, %v4261_v52  ;;  %v3686_v52 = vld [vmem:[%s4697_s3 + $0x1d8] sm:$0xff]  }
  0xfb   :  { %v1236_v34 = vadd.f32 %v3149_v28, %v231_v33  ;;  %v3660_v28 = vld [vmem:[%s4697_s3 + $0xc8] sm:$0xff]  }
  0xfc   :  { %v3661_v31 = vld [vmem:[%s4697_s3 + $0x88] sm:$0xff]   ;;  %v1576_v33 = vpack.c.bf16 %v1559_v29, %v1559_v29 }
 0x117   :  { %v3169_v35 = vpop.f32.mrb[4].mxu1 }
 0x118   :  { %v3170_v36 = vpop.f32.mrb[5].mxu1 }
 0x119   :  { %v3171_v37 = vadd.f32 %v3170_v36, %v3169_v35  ;;  %v3172_v38 = vpop.f32.mrb[6].mxu1  ;;  %v3662_v35 = vld [vmem:[%s4697_s3 + $0xd0] sm:$0xff]  }
 0x11a   :  { %v3173_v39 = vpop.f32.mrb[7].mxu1  ;;  %v3663_v36 = vld [vmem:[%s4697_s3 + $0x90] sm:$0xff]   ;;  %v3665_v38 = vld [vmem:[%s4697_s3 + $0x98] sm:$0xff]  }
 0x11b   :  { %v1276_v40 = vadd.f32 %v3171_v37, %v1236_v34  ;;  %v3664_v37 = vld [vmem:[%s4697_s3 + $0xd8] sm:$0xff]   ;;  %v3666_v39 = vld [vmem:[%s4697_s3 + $0xe0] sm:$0xff]  }
 0x13b   :  { %v1315_v61 = vpop.f32.mrb[8].mxu1 }
 0x13c   :  { %v1316_v0 = vadd.f32 %v1315_v61, %v1276_v40  ;;  %v1317_v1 = vpop.f32.mrb[9].mxu1  ;;  %v3667_v40 = vld [vmem:[%s4697_s3 + $0xa0] sm:$0xff]  }
 0x13d   :  { %v1318_v2 = vpop.f32.mrb[10].mxu1  ;;  %v3690_v61 = vld [vmem:[%s4697_s3 + $0x1e0] sm:$0xff]   ;;  %v3698_v1 = vld [vmem:[%s4697_s3 + $0x1f0] sm:$0xff]  }
 0x13e   :  { %v1319_v3 = vpop.f32.mrb[11].mxu1  ;;  %v1323_v30 = vmax.f32 %v1316_v0, 0.0  ;;  %v3695_v0 = vld [vmem:[%s4697_s3 + $0x1a8] sm:$0xff]   ;;  %v3699_v2 = vld [vmem:[%s4697_s3 + $0x1b0] sm:$0xff]  }
 0x13f   :  { %v3702_v3 = vld [vmem:[%s4697_s3 + $0x1f8] sm:$0xff]  }
 0x140   :  { %v1326_v34 = vpack.c.bf16 %v1323_v30, %v1323_v30 }
 0x179   :  { %v1194_v13 = vpop.f32.mrb[0].mxu0 }
 0x17a   :  { %v3463_v16 = vadd.f32 %v1194_v13, %v229_v11  ;;  %v1196_v17 = vpop.f32.mrb[1].mxu0 }
 0x17b   :  { %v3464_v18 = vadd.f32 %v1196_v17, %v230_v12  ;;  %v1198_v19 = vpop.f32.mrb[2].mxu0 }
 0x17c   :  { %v1321_v21 = vmax.f32 %v3463_v16, 0.0  ;;  %v1199_v22 = vpop.f32.mrb[3].mxu0 }
 0x17d   :  { %v1322_v24 = vmax.f32 %v3464_v18, 0.0  ;;  %v233_v18 = vld [vmem:[%s4698_s4 + $0x30] ss:$0 sm:$0xff] }
 0x17e   :  { %v1324_v27 = vpack.c.bf16 %v1321_v21, %v1321_v21 }
 0x17f   :  { %v1325_v25 = vpack.c.bf16 %v1322_v24, %v1322_v24 }
 0x181   :  { %1469 = vmatprep.mubr.bf16.mxu1 %v1325_v25 }
 0x182   :  { %1470 = vmatmul.mubr.bf16.vlgmr.msra.gmra.mrb[12].mxu1 %v1324_v27 }
 0x183   :  { %3320 = vmatpush3.bf16.msra.mxu1 %v1435_v26  ;;  %3321 = vmatprep.mubr.msk.bf16.mxu1 %vm4704_vm2, %v3744_v32 }
 0x184   :  { %3199 = vmatprep.subr.bf16.mxu1 %v3660_v28  ;;  %v234_v28 = vld [vmem:[%s4698_s4 + $0x31] ss:$0 sm:$0xff] }
 0x18a   :  { %3322 = vmatmul.mubr.msk.bf16.vlgmr.msra.gmra.mrb[16].mxu1 %vm1426_vm5, %v1326_v34 }
 0x18b   :  { %3200 = vmatpush3.bf16.msra.mxu1 %v3661_v31  ;;  %1901 = vmatprep.mubr.bf16.mxu1 %v1576_v33 }
 0x18c   :  { %3201 = vmatprep.subr.bf16.mxu1 %v3662_v35 }
 0x18f   :  { %3202 = vmatpush3.bf16.msra.mxu1 %v3663_v36  ;;  %v4427_v36 = vand.u32 127, %v21_v43 }
 0x190   :  { %3203 = vmatprep.subr.bf16.mxu1 %v3664_v37 }
 0x191   :  { %v25_v37 = vmul.u32 4, %v4427_v36 }
 0x193   :  { %3204 = vmatpush3.bf16.msra.mxu1 %v3665_v38  ;;  %v27_v38 = vadd.s32 4, %v25_v37  ;;  %vm26_vm7 = vcmp.ge.s32.totalorder %v4249_v46, %v25_v37 }
 0x194   :  { %3205 = vmatprep.subr.bf16.mxu1 %v3666_v39 }
 0x195   :  { %vm28_vm8 = vcmp.lt.s32.totalorder %v4249_v46, %v27_v38 }
 0x196   :  { %vm29_vm9 = vmand %vm26_vm7, %vm28_vm8 }
 0x197   :  { %3206 = vmatpush3.bf16.msra.mxu1 %v3667_v40  ;;  %v30_v43 = vsel %vm29_vm9, 1.0, %v3744_v32 }
 0x198   :  { %3207 = vmatprep.subr.bf16.mxu1 %v3668_v41  ;;  %v4438_v50 = vpack.c.bf16 %v30_v43, %v30_v43 }
 0x199   :  { %v3237_v8 = vpop.f32.mrb[4].mxu0 }
 0x19a   :  { %v3238_v9 = vpop.f32.mrb[5].mxu0 }
 0x19b   :  { %3208 = vmatpush3.bf16.msra.mxu1 %v3669_v42  ;;  %v3239_v10 = vadd.f32 %v3238_v9, %v3237_v8  ;;  %v3240_v11 = vpop.f32.mrb[6].mxu0 }
 0x19c   :  { %3209 = vmatprep.subr.bf16.mxu1 %v3670_v44  ;;  %v3241_v12 = vpop.f32.mrb[7].mxu0 }
 0x19f   :  { %3210 = vmatpush3.bf16.msra.mxu1 %v3671_v45 }
 0x1a0   :  { %3211 = vmatprep.subr.bf16.mxu1 %v3672_v47 }
 0x1a3   :  { %3212 = vmatpush3.bf16.msra.mxu1 %v3673_v48 }
 0x1a4   :  { %3213 = vmatprep.subr.bf16.mxu1 %v3674_v49 }
 0x1a7   :  { %3214 = vmatpush3.bf16.msra.mxu1 %v3675_v51 }
 0x1a8   :  { %3243 = vmatprep.subr.bf16.mxu1 %v3678_v54 }
 0x1aa   :  { %1902 = vmatmul.mubr.bf16.vlgmr.msra.gmra.mrb[20].mxu1 %v1575_v55 }
 0x1ab   :  { %3244 = vmatpush3.bf16.msra.mxu1 %v3679_v56  ;;  %1981 = vmatprep.mubr.bf16.mxu1 %v1580_v57  ;;  %v38_v57 = vmul.u32 25, %v4427_v36 }
 0x1ac   :  { %3245 = vmatprep.subr.bf16.mxu1 %v3682_v58  ;;  %v32_v58 = vadd.s32 8, %v4249_v46 }
 0x1ad   :  { %vm39_vm12 = vcmp.ge.s32.totalorder %v4249_v46, %v38_v57 }
 0x1ae   :  { %vm40_vm13 = vcmp.ge.s32.totalorder %v32_v58, %v38_v57 }
 0x1af   :  { %3246 = vmatpush3.bf16.msra.mxu1 %v3683_v59  ;;  %v46_v59 = vadd.s32 25, %v38_v57 }
 0x1b0   :  { %3247 = vmatprep.subr.bf16.mxu1 %v3686_v52  ;;  %v33_v52 = vadd.s32 16, %v4249_v46 }
 0x1b1   :  { %vm47_vm14 = vcmp.lt.s32.totalorder %v4249_v46, %v46_v59  ;;  %vm48_vm15 = vcmp.lt.s32.totalorder %v32_v58, %v46_v59 }
 0x1b2   :  { %vm54_vm3 = vmand %vm39_vm12, %vm47_vm14  ;;  %vm41_vm4 = vcmp.ge.s32.totalorder %v33_v52, %v38_v57  ;;  %vm49_vm5 = vcmp.lt.s32.totalorder %v33_v52, %v46_v59 }
 0x1b3   :  { %3248 = vmatpush3.bf16.msra.mxu1 %v3687_v60  ;;  %v34_v60 = vadd.s32 24, %v4249_v46  ;;  %vm55_vm7 = vmand %vm40_vm13, %vm48_vm15 }
 0x1b4   :  { %3249 = vmatprep.subr.bf16.mxu1 %v3690_v61  ;;  %vm4456_vm0 = vmpackc.low %vm55_vm7, %vm54_vm3 }
 0x1b5   :  { %vm42_vm8 = vcmp.ge.s32.totalorder %v34_v60, %v38_v57  ;;  %vm50_vm9 = vcmp.lt.s32.totalorder %v34_v60, %v46_v59 }
 0x1b6   :  { %vm57_vm1 = vmand %vm42_vm8, %vm50_vm9 }
 0x1b7   :  { %3250 = vmatpush3.bf16.msra.mxu1 %v3691_v62  ;;  %v3748_v62 = vmov 1.0|1.0  }
 0x1b8   :  { %3251 = vmatprep.subr.bf16.mxu1 %v3694_v63  ;;  %3332 = vmatpush3.bf16.msk.msra.mxu0 %vm4456_vm0, %v3748_v62 }
 0x1b9   :  { %3333 = vmatprep.subr.bf16.mxu0 %v3744_v32 }
 0x1bb   :  { %3252 = vmatpush3.bf16.msra.mxu1 %v3695_v0  ;;  %v35_v0 = vadd.s32 32, %v4249_v46 }
 0x1bc   :  { %3253 = vmatprep.subr.bf16.mxu1 %v3698_v1  ;;  %v36_v1 = vadd.s32 40, %v4249_v46 }
 0x1bd   :  { %vm43_vm12 = vcmp.ge.s32.totalorder %v35_v0, %v38_v57  ;;  %vm51_vm14 = vcmp.lt.s32.totalorder %v35_v0, %v46_v59 }
 0x1be   :  { %vm44_vm13 = vcmp.ge.s32.totalorder %v36_v1, %v38_v57  ;;  %vm52_vm15 = vcmp.lt.s32.totalorder %v36_v1, %v46_v59 }
 0x1bf   :  { %3254 = vmatpush3.bf16.msra.mxu1 %v3699_v2  ;;  %v37_v2 = vadd.s32 48, %v4249_v46 }
 0x1c0   :  { %3255 = vmatprep.subr.bf16.mxu1 %v3702_v3 }
 0x1c1   :  { %vm53_vm3 = vcmp.lt.s32.totalorder %v37_v2, %v46_v59 }
 0x1c3   :  { %3256 = vmatpush3.bf16.msra.mxu1 %v3703_v4 }
 0x1c4   :  { %3257 = vmatprep.subr.bf16.mxu1 %v3706_v5 }
 0x1c7   :  { %3258 = vmatpush3.bf16.msra.mxu1 %v3708_v6 }
 0x1c8   :  { %3325 = vmatprep.subr.bf16.mxu1 %v3744_v32 }
 0x1ca   :  { %1982 = vmatmul.mubr.bf16.vlgmr.msra.gmra.mrb[24].mxu1 %v1579_v7 }
 0x1cb   :  { %3327 = vmatprep.mubr.msk.bf16.mxu1 %vm4704_vm2, %v3744_v32 }
 0x255   :  { %v3191_v13 = vpop.f32.mrb[12].mxu1 }
 0x256   :  { %v3192_v14 = vpop.f32.mrb[13].mxu1 }
 0x257   :  { %v3193_v15 = vadd.f32 %v3192_v14, %v3191_v13  ;;  %v3194_v16 = vpop.f32.mrb[14].mxu1 }
 0x258   :  { %v3195_v17 = vpop.f32.mrb[15].mxu1 }
 0x259   :  { %v1472_v19 = vadd.f32 %v3193_v15, %v233_v18 }
 0x25d   :  { %v1511_v20 = vpop.f32.mrb[16].mxu1 }
 0x25e   :  { %v1512_v21 = vadd.f32 %v1511_v20, %v1472_v19  ;;  %v3323_v22 = vpop.f32.mrb[17].mxu1 }
 0x25f   :  { %v1514_v23 = vpop.f32.mrb[18].mxu1 }
 0x260   :  { %v1517_v24 = vmax.f32 %v1512_v21, 0.0  ;;  %v3324_v25 = vpop.f32.mrb[19].mxu1  ;;  %v72_v23 = vmul.u32 25, %v4249_v46 }
 0x262   :  { %v1519_v26 = vsel %vm1518_vm6, %v1517_v24, 0.0 }
 0x263   :  { %1520 = vadd.xlane.f32.xlu0 %v1519_v26 }
 0x27d   :  { %v3215_v27 = vpop.f32.mrb[20].mxu1 }
 0x27e   :  { %v3216_v29 = vpop.f32.mrb[21].mxu1 }
 0x27f   :  { %v3217_v30 = vadd.f32 %v3216_v29, %v3215_v27  ;;  %v3218_v31 = vpop.f32.mrb[22].mxu1 }
 0x280   :  { %v3219_v33 = vpop.f32.mrb[23].mxu1 }
 0x281   :  { %v1904_v34 = vadd.f32 %v3217_v30, %v234_v28 }
 0x283   :  { %v1944_v35 = vadd.f32 %v3239_v10, %v1904_v34 }
 0x29d   :  { %v3259_v39 = vpop.f32.mrb[24].mxu1 }
 0x29e   :  { %v3260_v40 = vpop.f32.mrb[25].mxu1 }
 0x29f   :  { %v3261_v41 = vadd.f32 %v3260_v40, %v3259_v39  ;;  %v3262_v42 = vpop.f32.mrb[26].mxu1 }
 0x2a0   :  { %v3263_v44 = vpop.f32.mrb[27].mxu1 }
 0x2a1   :  { %v1984_v45 = vadd.f32 %v3261_v41, %v1944_v35 }
 0x2a3   :  { %v4432_v47 = vmax.f32 %v1984_v45, 0.0 }
 0x2a5   :  { %v1990_v48 = vpack.c.bf16 %v4432_v47, %v4432_v47 }
 0x2a7   :  { %v1997_v49 = vsel %vm1995_vm10, %v1990_v48, 0 }
 0x2a8   :  { %3326 = vmatpush3.bf16.msra.mxu1 %v1997_v49 }
 0x2a9   :  { %3343 = vmatprep.subr.bf16.mxu1 %v3744_v32 }
 0x2ab   :  { %3328 = vmatmul.mubr.msk.bf16.vlgmr.msra.gmra.mrb[28].mxu1 %vm4702_vm11, %v4438_v50  ;;  %vm56_vm11 = vmand %vm41_vm4, %vm49_vm5 }
 0x2ac   :  { %3345 = vmatprep.mubr.msk.bf16.mxu1 %vm4704_vm2, %v3744_v32  ;;  %vm4464_vm2 = vmpackc.low %vm57_vm1, %vm56_vm11  ;;  %vm45_vm11 = vcmp.ge.s32.totalorder %v37_v2, %v38_v57 }
 0x2ad   :  { %3334 = vmatpush3.bf16.msk.msra.mxu0 %vm4464_vm2, %v3748_v62  ;;  %vm58_vm1 = vmand %vm43_vm12, %vm51_vm14  ;;  %vm4712_vm12 = vmmov 0  }
 0x2ae   :  { %3335 = vmatprep.subr.bf16.mxu0 %v3744_v32  ;;  %vm59_vm4 = vmand %vm44_vm13, %vm52_vm15  ;;  %vm73_vm13 = vcmp.ge.s32.totalorder %v4427_v36, %v72_v23 }
 0x2af   :  { %vm4475_vm5 = vmpackc.low %vm59_vm4, %vm58_vm1  ;;  %vm2088_vm1 = vcmask 11264  }
 0x2b0   :  { %vm60_vm7 = vmand %vm45_vm11, %vm53_vm3  ;;  %vm2096_vm11 = vcmask 15364   ;;  %vm4713_vm3 = vcmask 1043456  }
 0x2b1   :  { %3336 = vmatpush3.bf16.msk.msra.mxu0 %vm4475_vm5, %v3748_v62  ;;  %v67_v4 = vsel %vm60_vm7, 1.0, %v3744_v32  ;;  %vm4714_vm4 = vmmov %vm4713_vm3  ;;  %vm4715_vm7 = vcmask 15360  }
 0x2b2   :  { %3337 = vmatprep.subr.bf16.mxu0 %v3744_v32  ;;  %v71_v5 = vpack.c.bf16 %v67_v4, %v67_v4 }
 0x2b4   :  { %v4485_v6 = vsel %vm1995_vm10, %v71_v5, 0 }
 0x2b5   :  { %3338 = vmatpush3.bf16.msra.mxu0 %v4485_v6 }
 0x2b6   :  { %3361 = vmatprep.subr.bf16.mxu0 %v3744_v32 }
 0x2f0   :  { %v1521_v51 = vpop.xlane.xlu0 %1520 }
 0x2f1   :  { %v1523_v53 = vmul.f32 0.02, %v1521_v51 }
 0x2f3   :  { %v4445_v54 = vsub.f32 %v1517_v24, %v1523_v53  ;;  %v74_v24 = vadd.s32 25, %v72_v23 }
 0x2f5   :  { %v1525_v55 = vmul.f32 %v4445_v54, %v4445_v54  ;;  %vm75_vm14 = vcmp.lt.s32.totalorder %v4427_v36, %v74_v24 }
 0x2f6   :  { %vm76_vm15 = vmand %vm73_vm13, %vm75_vm14 }
 0x2f7   :  { %v1526_v56 = vsel %vm1518_vm6, %v1525_v55, 0.0  ;;  %v77_v25 = vsel %vm76_vm15, 1.0, %v3744_v32  ;;  %vm4717_vm15 = vmmov %vm4715_vm7 }
 0x2f8   :  { %1527 = vadd.xlane.f32.xlu0 %v1526_v56  ;;  %v78_v26 = vpack.c.bf16 %v77_v25, %v77_v25 }
 0x2fa   :  { %v4501_v27 = vsel %vm1995_vm10, %v78_v26, 0 }
 0x2fb   :  { %3344 = vmatpush3.bf16.msra.mxu1 %v4501_v27 }
 0x2fc   :  { %3349 = vmatprep.subr.bf16.mxu1 %v3744_v32 }
 0x37e   :  { %v2033_v7 = vpop.f32.mrb[28].mxu1 }
 0x37f   :  { %v3329_v8 = vpop.f32.mrb[29].mxu1 }
 0x380   :  { %v2036_v9 = vpop.f32.mrb[30].mxu1 }
 0x381   :  { %v3330_v10 = vpop.f32.mrb[31].mxu1 }
 0x385   :  { %v1528_v11 = vpop.xlane.xlu0 %1527 }
 0x386   :  { %v1529_v12 = vmul.f32 0.020408163, %v1528_v11 }
 0x388   :  { %3721 = vrsqrt.f32 %v1529_v12  ;;  %vm1532_vm8 = vcmp.eq.f32.partialorder %v1529_v12, inf  ;;  %v1535_v15 = vand.u32 2147483648, %v1529_v12  ;;  %vm1534_vm9 = vcmp.eq.f32.partialorder %v1529_v12, 0.0 }
 0x392   :  { %v3722_v13 = vpop.eup %3721 }
 0x393   :  { %v1531_v14 = vmul.f32 %v3722_v13, %v1529_v12 }
 0x395   :  { %v1533_v16 = vsel %vm1532_vm8, %v1529_v12, %v1531_v14  ;;  %vm2176_vm8 = vcmask 404480  }
 0x396   :  { %v1536_v17 = vsel %vm1534_vm9, %v1535_v15, %v1533_v16  ;;  %vm4716_vm9 = vmmov %vm4715_vm7 }
 0x397   :  { %v1537_v18 = vadd.f32 1e-06, %v1536_v17 }
 0x399   :  { %3723 = vrcp.f32 %v1537_v18 }
 0x3a3   :  { %v3724_v19 = vpop.eup %3723 }
 0x3a4   :  { %v4490_v20 = vmul.f32 %v3724_v19, %v4445_v54 }
 0x3a6   :  { %v2039_v21 = vmul.f32 %v2033_v7, %v4490_v20 }
 0x3a8   :  { %v2040_v22 = vpack.c.bf16 %v2039_v21, %v2039_v21 }
 0x3aa   :  { %3340 = vmatmul.mubr.msk.bf16.vlgmr.msra.gmra.mrb[8].mxu0 %vm1518_vm6, %v2040_v22 }
 0x3ab   :  { %3363 = vmatprep.mubr.msk.bf16.mxu0 %vm4712_vm12, %v3744_v32  ;;  %3362 = vmatpush3.bf16.msra.mxu0 %v4501_v27 }
 0x3ac   :  { %3367 = vmatprep.subr.bf16.mxu0 %v3744_v32 }
 0x47d   :  { %v2081_v46 = vpop.f32.mrb[8].mxu0 }
 0x47e   :  { %v2087_v28 = vmul.f32 0.2, %v2081_v46  ;;  %v3341_v29 = vpop.f32.mrb[9].mxu0 }
 0x47f   :  { %v2084_v30 = vpop.f32.mrb[10].mxu0 }
 0x480   :  { %v2089_v31 = vsel %vm2088_vm1, %v2087_v28, -inf  ;;  %v2097_v33 = vsel %vm2096_vm11, %v2087_v28, -inf  ;;  %v3342_v34 = vpop.f32.mrb[11].mxu0  ;;  %vm2719_vm11 = vcmask 402432  }
 0x481   :  { %v2090_v35 = vrot.slane %v2089_v31, 4  ;;  %v2098_v36 = vrot.slane %v2097_v33, 4 }
 0x483   :  { %v2091_v37 = vmax.f32 %v2089_v31, %v2090_v35  ;;  %v2099_v38 = vmax.f32 %v2097_v33, %v2098_v36 }
 0x485   :  { %v2092_v39 = vrot.slane %v2091_v37, 2  ;;  %v2100_v40 = vrot.slane %v2099_v38, 2 }
 0x487   :  { %v2093_v41 = vmax.f32 %v2091_v37, %v2092_v39  ;;  %v2101_v42 = vmax.f32 %v2099_v38, %v2100_v40 }
 0x489   :  { %v2094_v44 = vrot.slane %v2093_v41, 1  ;;  %v2102_v45 = vrot.slane %v2101_v42, 1 }
 0x48b   :  { %v2095_v43 = vmax.f32 %v2093_v41, %v2094_v44  ;;  %v2103_v48 = vmax.f32 %v2101_v42, %v2102_v45 }
 0x48d   :  { %v2104_v49 = vsel %vm4713_vm3, %v2095_v43, %v2103_v48  ;;  %vm4721_vm3 = vcmask 64512  }
 0x48e   :  { %v2105_v51 = vsub.f32 %v2087_v28, %v2104_v49 }
 0x490   :  { %v2106_v53 = vmul.f32 1.442695, %v2105_v51 }
 0x492   :  { %3725 = vpow2.f32 %v2106_v53 }
 0x49c   :  { %v3726_v54 = vpop.eup %3725 }
 0x49d   :  { %v2108_v55 = vsel %vm2088_vm1, %v3726_v54, 0.0  ;;  %v2116_v56 = vrot.slane %v3726_v54, 4 }
 0x49e   :  { %v2109_v57 = vrot.slane %v2108_v55, 4 }
 0x49f   :  { %v2118_v58 = vsel %vm2088_vm1, %v2116_v56, 0.0  ;;  %vm4718_vm1 = vmmov %vm4715_vm7 }
 0x4a0   :  { %v2110_v59 = vadd.f32 %v2109_v57, %v2108_v55  ;;  %v2119_v52 = vrot.slane %v2118_v58, 4 }
 0x4a2   :  { %v2111_v60 = vrot.slane %v2110_v59, 2  ;;  %v2120_v0 = vadd.f32 %v2119_v52, %v2118_v58 }
 0x4a4   :  { %v2112_v1 = vadd.f32 %v2111_v60, %v2110_v59  ;;  %v2121_v2 = vrot.slane %v2120_v0, 2 }
 0x4a6   :  { %v2113_v4 = vrot.slane %v2112_v1, 1  ;;  %v2122_v5 = vadd.f32 %v2121_v2, %v2120_v0 }
 0x4a8   :  { %v2123_v7 = vrot.slane %v2122_v5, 1  ;;  %v2114_v8 = vadd.f32 %v2113_v4, %v2112_v1 }
 0x4aa   :  { %v2124_v9 = vadd.f32 %v2123_v7, %v2122_v5  ;;  %v3709_v5 = vld [vmem:[%s4697_s3 + $0x208] sm:$0xff]  }
 0x4ac   :  { %v2125_v10 = vsel %vm4714_vm4, %v2114_v8, %v2124_v9  ;;  %v3710_v8 = vld [vmem:[%s4697_s3 + $0x210] sm:$0xff]   ;;  %v3711_v9 = vld [vmem:[%s4697_s3 + $0x218] sm:$0xff]   ;;  %vm4722_vm4 = vmmov %vm4721_vm3 }
 0x4ad   :  { %3727 = vrcp.f32 %v2125_v10  ;;  %v3712_v10 = vld [vmem:[%s4697_s3 + $0x220] ss:$0 sps:$4 sm:$0x11]  }
 0x4b7   :  { %v3728_v11 = vpop.eup %3727 }
 0x4b8   :  { %v2127_v12 = vmul.f32 %v3728_v11, %v3726_v54  ;;  %v2414_v11 = vsel %vm1995_vm10, %v3712_v10, 0 }
 0x4ba   :  { %v2128_v13 = vpack.c.bf16 %v2127_v12, %v2127_v12  ;;  %v3713_v12 = vld [vmem:[%s4697_s3 + $0x228] sm:$0xff]  }
 0x4bc   :  { %3346 = vmatmul.mubr.msk.bf16.vlgmr.msra.gmra.mrb[32].mxu1 %vm4715_vm7, %v2128_v13  ;;  %v3714_v13 = vld [vmem:[%s4697_s3 + $0x230] sm:$0xff]   ;;  %vm2851_vm7 = vcmask 60416  }
 0x4bd   :  { %3350 = vmatpush3.bf16.msk.msra.mxu1 %vm4456_vm0, %v3748_v62  ;;  %3357 = vmatprep.mubr.msk.bf16.mxu1 %vm4712_vm12, %v3744_v32 }
 0x4be   :  { %3351 = vmatprep.subr.bf16.mxu1 %v3744_v32 }
 0x4c1   :  { %3352 = vmatpush3.bf16.msk.msra.mxu1 %vm4464_vm2, %v3748_v62 }
 0x4c2   :  { %3353 = vmatprep.subr.bf16.mxu1 %v3744_v32 }
 0x4c5   :  { %3354 = vmatpush3.bf16.msk.msra.mxu1 %vm4475_vm5, %v3748_v62 }
 0x4c6   :  { %3355 = vmatprep.subr.bf16.mxu1 %v3744_v32 }
 0x4c9   :  { %3356 = vmatpush3.bf16.msra.mxu1 %v4485_v6 }
 0x4ca   :  { %3379 = vmatprep.subr.bf16.mxu1 %v3744_v32 }
 0x58f   :  { %v2169_v14 = vpop.f32.mrb[32].mxu1 }
 0x590   :  { %v2175_v15 = vmul.f32 %v2169_v14, %v4490_v20  ;;  %v3347_v16 = vpop.f32.mrb[33].mxu1  ;;  %v237_v14 = vld [vmem:[%s4698_s4 + $0x34] ss:$0 sm:$0xff] }
 0x591   :  { %v2172_v17 = vpop.f32.mrb[34].mxu1  ;;  %v238_v16 = vld [vmem:[%s4698_s4 + $0x35] ss:$0 sm:$0xff] }
 0x592   :  { %v2177_v18 = vsel %vm2176_vm8, %v2175_v15, 0.0  ;;  %v2185_v19 = vrot.slane %v2175_v15, 4  ;;  %v3348_v21 = vpop.f32.mrb[35].mxu1 }
 0x593   :  { %v2178_v22 = vrot.slane %v2177_v18, 4 }
 0x594   :  { %v2187_v23 = vsel %vm2176_vm8, %v2185_v19, 0.0  ;;  %vm2875_vm8 = vcmask 467968  }
 0x595   :  { %v2179_v24 = vadd.f32 %v2178_v22, %v2177_v18  ;;  %v2188_v25 = vrot.slane %v2187_v23, 4 }
 0x597   :  { %v2180_v26 = vrot.slane %v2179_v24, 2  ;;  %v2189_v46 = vadd.f32 %v2188_v25, %v2187_v23  ;;  %v3715_v25 = vld [vmem:[%s4697_s3 + $0x238] sm:$0xff]  }
 0x599   :  { %v2181_v28 = vadd.f32 %v2180_v26, %v2179_v24  ;;  %v2190_v29 = vrot.slane %v2189_v46, 2  ;;  %v3716_v26 = vld [vmem:[%s4697_s3 + $0x240] ss:$0 sps:$4 sm:$0x11]  }
 0x59b   :  { %v2182_v30 = vrot.slane %v2181_v28, 1  ;;  %v2191_v31 = vadd.f32 %v2190_v29, %v2189_v46  ;;  %v2483_v46 = vsel %vm1995_vm10, %v3716_v26, 0 }
 0x59d   :  { %v2192_v33 = vrot.slane %v2191_v31, 1  ;;  %v2183_v34 = vadd.f32 %v2182_v30, %v2181_v28  ;;  %v235_v28 = vld [vmem:[%s4698_s4 + $0x32] ss:$0 sm:$0xff] }
 0x59f   :  { %v2193_v35 = vadd.f32 %v2192_v33, %v2191_v31 }
 0x5a1   :  { %v2194_v20 = vsel %vm1995_vm10, %v2183_v34, %v2193_v35 }
 0x5a2   :  { %v2195_v36 = vadd.f32 %v2194_v20, %v4432_v47 }
 0x5a4   :  { %v2196_v37 = vpack.c.bf16 %v2195_v36, %v2195_v36 }
 0x5a6   :  { %3358 = vmatmul.mubr.msk.bf16.vlgmr.msra.gmra.mrb[36].mxu1 %vm1518_vm6, %v2196_v37 }
 0x5a7   :  { %3380 = vmatpush3.bf16.msra.mxu1 %v4501_v27  ;;  %3381 = vmatprep.mubr.msk.bf16.mxu1 %vm4712_vm12, %v3744_v32 }
 0x5a8   :  { %3385 = vmatprep.subr.bf16.mxu1 %v3744_v32 }
 0x679   :  { %v2234_v38 = vpop.f32.mrb[36].mxu1 }
 0x67a   :  { %v2240_v39 = vmul.f32 0.04, %v2234_v38  ;;  %v3359_v40 = vpop.f32.mrb[37].mxu1 }
 0x67b   :  { %v2237_v41 = vpop.f32.mrb[38].mxu1 }
 0x67c   :  { %v2241_v42 = vpack.c.bf16 %v2240_v39, %v2240_v39  ;;  %v3360_v44 = vpop.f32.mrb[39].mxu1 }
 0x67e   :  { %3364 = vmatmul.mubr.msk.bf16.vlgmr.msra.gmra.mrb[12].mxu0 %vm4716_vm9, %v2241_v42 }
 0x67f   :  { %3368 = vmatpush3.bf16.msk.msra.mxu0 %vm4456_vm0, %v3748_v62  ;;  %3375 = vmatprep.mubr.msk.bf16.mxu0 %vm4712_vm12, %v3744_v32 }
 0x680   :  { %3369 = vmatprep.subr.bf16.mxu0 %v3744_v32 }
 0x683   :  { %3370 = vmatpush3.bf16.msk.msra.mxu0 %vm4464_vm2, %v3748_v62 }
 0x684   :  { %3371 = vmatprep.subr.bf16.mxu0 %v3744_v32 }
 0x687   :  { %3372 = vmatpush3.bf16.msk.msra.mxu0 %vm4475_vm5, %v3748_v62 }
 0x688   :  { %3373 = vmatprep.subr.bf16.mxu0 %v3744_v32 }
 0x68b   :  { %3374 = vmatpush3.bf16.msra.mxu0 %v4485_v6 }
 0x68c   :  { %3397 = vmatprep.subr.bf16.mxu0 %v3744_v32 }
 0x751   :  { %v2279_v47 = vpop.f32.mrb[12].mxu0 }
 0x752   :  { %v2285_v45 = vsub.f32 %v2195_v36, %v2279_v47  ;;  %v3365_v43 = vpop.f32.mrb[13].mxu0  ;;  %v236_v36 = vld [vmem:[%s4698_s4 + $0x33] ss:$0 sm:$0xff] }
 0x753   :  { %v2282_v48 = vpop.f32.mrb[14].mxu0 }
 0x754   :  { %v2286_v49 = vmul.f32 %v2285_v45, %v2285_v45  ;;  %v3366_v51 = vpop.f32.mrb[15].mxu0  ;;  %v2341_v15 = vmul.f32 %v2285_v45, %v237_v14 }
 0x756   :  { %v2287_v53 = vpack.c.bf16 %v2286_v49, %v2286_v49 }
 0x758   :  { %3376 = vmatmul.mubr.msk.bf16.vlgmr.msra.gmra.mrb[16].mxu0 %vm1518_vm6, %v2287_v53 }
 0x759   :  { %3405 = vmatprep.mubr.msk.bf16.mxu0 %vm4712_vm12, %v3744_v32  ;;  %3398 = vmatpush3.bf16.msra.mxu0 %v3713_v12 }
 0x75a   :  { %3399 = vmatprep.subr.bf16.mxu0 %v3744_v32 }
 0x75d   :  { %3400 = vmatpush3.bf16.msra.mxu0 %v3714_v13 }
 0x75e   :  { %3401 = vmatprep.subr.bf16.mxu0 %v3744_v32 }
 0x761   :  { %3402 = vmatpush3.bf16.msra.mxu0 %v3715_v25 }
 0x762   :  { %3403 = vmatprep.subr.bf16.mxu0 %v3744_v32 }
 0x765   :  { %3404 = vmatpush3.bf16.msra.mxu0 %v2483_v46 }
 0x766   :  { %3421 = vmatprep.subr.bf16.mxu0 %v3744_v32 }
 0x82b   :  { %v2325_v54 = vpop.f32.mrb[16].mxu0 }
 0x82c   :  { %v2331_v55 = vmul.f32 0.041666668, %v2325_v54  ;;  %v3377_v56 = vpop.f32.mrb[17].mxu0 }
 0x82d   :  { %v2328_v57 = vpop.f32.mrb[18].mxu0 }
 0x82e   :  { %3729 = vrsqrt.f32 %v2331_v55  ;;  %v3378_v58 = vpop.f32.mrb[19].mxu0  ;;  %vm2334_vm13 = vcmp.eq.f32.partialorder %v2331_v55, inf  ;;  %v2337_v60 = vand.u32 2147483648, %v2331_v55  ;;  %vm2336_vm14 = vcmp.eq.f32.partialorder %v2331_v55, 0.0 }
 0x838   :  { %v3730_v59 = vpop.eup %3729 }
 0x839   :  { %v2333_v52 = vmul.f32 %v3730_v59, %v2331_v55 }
 0x83b   :  { %v2335_v0 = vsel %vm2334_vm13, %v2331_v55, %v2333_v52 }
 0x83c   :  { %v2338_v1 = vsel %vm2336_vm14, %v2337_v60, %v2335_v0 }
 0x83d   :  { %v2339_v2 = vadd.f32 1e-06, %v2338_v1 }
 0x83f   :  { %3731 = vrcp.f32 %v2339_v2 }
 0x849   :  { %v3732_v4 = vpop.eup %3731 }
 0x84a   :  { %v2342_v7 = vpack.c.bf16 %v3732_v4, %v3732_v4 }
 0x84c   :  { %3382 = vmatmul.mubr.msk.bf16.vlgmr.msra.gmra.mrb[40].mxu1 %vm4717_vm15, %v2342_v7  ;;  %v239_v7 = vld [vmem:[%s4698_s4 + $0x36] ss:$0 sm:$0xff] }
 0x84d   :  { %3386 = vmatpush3.bf16.msra.mxu1 %v3709_v5  ;;  %3393 = vmatprep.mubr.msk.bf16.mxu1 %vm4712_vm12, %v3744_v32 }
 0x84e   :  { %3387 = vmatprep.subr.bf16.mxu1 %v3744_v32 }
 0x851   :  { %3388 = vmatpush3.bf16.msra.mxu1 %v3710_v8 }
 0x852   :  { %3389 = vmatprep.subr.bf16.mxu1 %v3744_v32 }
 0x855   :  { %3390 = vmatpush3.bf16.msra.mxu1 %v3711_v9  ;;  %v240_v9 = vld [vmem:[%s4698_s4 + $0x37] ss:$0 sm:$0xff] }
 0x856   :  { %3391 = vmatprep.subr.bf16.mxu1 %v3744_v32 }
 0x859   :  { %3392 = vmatpush3.bf16.msra.mxu1 %v2414_v11 }
 0x85a   :  { %3409 = vmatprep.subr.bf16.mxu1 %v3744_v32 }
 0x91f   :  { %v2380_v17 = vpop.f32.mrb[40].mxu1 }
 0x920   :  { %v2386_v18 = vmul.f32 %v2380_v17, %v2341_v15  ;;  %v3383_v19 = vpop.f32.mrb[41].mxu1 }
 0x921   :  { %v2383_v21 = vpop.f32.mrb[42].mxu1  ;;  %v3718_v19 = vld [vmem:[%s4697_s3 + $0x250] sm:$0xff]  }
 0x922   :  { %v2387_v22 = vadd.f32 %v2386_v18, %v238_v16  ;;  %v3384_v23 = vpop.f32.mrb[43].mxu1  ;;  %v3717_v18 = vld [vmem:[%s4697_s3 + $0x248] sm:$0xff]   ;;  %v3719_v21 = vld [vmem:[%s4697_s3 + $0x258] sm:$0xff]  }
 0x924   :  { %v2388_v24 = vpack.c.bf16 %v2387_v22, %v2387_v22 }
 0x926   :  { %3394 = vmatmul.mubr.msk.bf16.vlgmr.msra.gmra.mrb[44].mxu1 %vm1518_vm6, %v2388_v24 }
 0x927   :  { %3410 = vmatpush3.bf16.msk.msra.mxu1 %vm4456_vm0, %v3748_v62  ;;  %3417 = vmatprep.mubr.msk.bf16.mxu1 %vm4712_vm12, %v3744_v32 }
 0x928   :  { %3411 = vmatprep.subr.bf16.mxu1 %v3744_v32 }
 0x92b   :  { %3412 = vmatpush3.bf16.msk.msra.mxu1 %vm4464_vm2, %v3748_v62 }
 0x92c   :  { %3413 = vmatprep.subr.bf16.mxu1 %v3744_v32 }
 0x92f   :  { %3414 = vmatpush3.bf16.msk.msra.mxu1 %vm4475_vm5, %v3748_v62 }
 0x930   :  { %3415 = vmatprep.subr.bf16.mxu1 %v3744_v32 }
 0x933   :  { %3416 = vmatpush3.bf16.msra.mxu1 %v4485_v6 }
 0x934   :  { %3439 = vmatprep.subr.bf16.mxu1 %v3744_v32 }
 0x9f9   :  { %v2450_v29 = vpop.f32.mrb[44].mxu1 }
 0x9fa   :  { %v2451_v30 = vadd.f32 %v2450_v29, %v235_v28  ;;  %v3395_v31 = vpop.f32.mrb[45].mxu1  ;;  %v3720_v28 = vld [vmem:[%s4697_s3 + $0x260] ss:$0 sps:$4 sm:$0x11]   ;;  %s3749_s3 = smov 50  }
 0x9fb   :  { %v2453_v33 = vpop.f32.mrb[46].mxu1  ;;  %v2796_v29 = vsel %vm1995_vm10, %v3720_v28, 0 }
 0x9fc   :  { %v2456_v34 = vmax.f32 %v2451_v30, 0.0  ;;  %v3396_v35 = vpop.f32.mrb[47].mxu1 }
 0x9fd   :  { %v241_v35 = vld [vmem:[%s4698_s4 + $0x48] ss:$0 sm:$0xff] }
 0x9fe   :  { %v2457_v20 = vpack.c.bf16 %v2456_v34, %v2456_v34 }
 0xa00   :  { %3406 = vmatmul.mubr.msk.bf16.vlgmr.msra.gmra.mrb[20].mxu0 %vm1518_vm6, %v2457_v20 }
 0xa01   :  { %3422 = vmatpush3.bf16.msra.mxu0 %v4501_v27  ;;  %3423 = vmatprep.mubr.msk.bf16.mxu0 %vm4712_vm12, %v3744_v32 }
 0xa02   :  { %3427 = vmatprep.subr.bf16.mxu0 %v3744_v32 }
 0xad3   :  { %v2519_v37 = vpop.f32.mrb[20].mxu0 }
 0xad4   :  { %v2520_v38 = vadd.f32 %v2519_v37, %v236_v36  ;;  %v3407_v39 = vpop.f32.mrb[21].mxu0 }
 0xad5   :  { %v2522_v40 = vpop.f32.mrb[22].mxu0 }
 0xad6   :  { %v2525_v41 = vadd.f32 %v2520_v38, %v2387_v22  ;;  %v3408_v42 = vpop.f32.mrb[23].mxu0 }
 0xad8   :  { %v2526_v44 = vpack.c.bf16 %v2525_v41, %v2525_v41 }
 0xada   :  { %3418 = vmatmul.mubr.msk.bf16.vlgmr.msra.gmra.mrb[48].mxu1 %vm1518_vm6, %v2526_v44 }
 0xadb   :  { %3440 = vmatpush3.bf16.msra.mxu1 %v4501_v27  ;;  %3441 = vmatprep.mubr.msk.bf16.mxu1 %vm4712_vm12, %v3744_v32 }
 0xadc   :  { %3445 = vmatprep.subr.bf16.mxu1 %v3744_v32 }
 0xbad   :  { %v2564_v47 = vpop.f32.mrb[48].mxu1 }
 0xbae   :  { %v2570_v45 = vmul.f32 0.04, %v2564_v47  ;;  %v3419_v43 = vpop.f32.mrb[49].mxu1 }
 0xbaf   :  { %v2567_v48 = vpop.f32.mrb[50].mxu1 }
 0xbb0   :  { %v2571_v49 = vpack.c.bf16 %v2570_v45, %v2570_v45  ;;  %v3420_v51 = vpop.f32.mrb[51].mxu1 }
 0xbb2   :  { %3424 = vmatmul.mubr.msk.bf16.vlgmr.msra.gmra.mrb[24].mxu0 %vm4718_vm1, %v2571_v49 }
 0xbb3   :  { %3428 = vmatpush3.bf16.msk.msra.mxu0 %vm4456_vm0, %v3748_v62  ;;  %3435 = vmatprep.mubr.msk.bf16.mxu0 %vm4712_vm12, %v3744_v32 }
 0xbb4   :  { %3429 = vmatprep.subr.bf16.mxu0 %v3744_v32 }
 0xbb7   :  { %3430 = vmatpush3.bf16.msk.msra.mxu0 %vm4464_vm2, %v3748_v62 }
 0xbb8   :  { %3431 = vmatprep.subr.bf16.mxu0 %v3744_v32 }
 0xbbb   :  { %3432 = vmatpush3.bf16.msk.msra.mxu0 %vm4475_vm5, %v3748_v62  ;;  %vm4719_vm5 = vmmov %vm4718_vm1 }
 0xbbc   :  { %3433 = vmatprep.subr.bf16.mxu0 %v3744_v32 }
 0xbbf   :  { %3434 = vmatpush3.bf16.msra.mxu0 %v4485_v6 }
 0xbc0   :  { %3451 = vmatprep.subr.bf16.mxu0 %v3744_v32 }
 0xc85   :  { %v2609_v61 = vpop.f32.mrb[24].mxu0 }
 0xc86   :  { %v2615_v27 = vsub.f32 %v2525_v41, %v2609_v61  ;;  %v3425_v53 = vpop.f32.mrb[25].mxu0 }
 0xc87   :  { %v2612_v54 = vpop.f32.mrb[26].mxu0 }
 0xc88   :  { %v2616_v55 = vmul.f32 %v2615_v27, %v2615_v27  ;;  %v3426_v56 = vpop.f32.mrb[27].mxu0  ;;  %v2671_v8 = vmul.f32 %v2615_v27, %v239_v7 }
 0xc8a   :  { %v2617_v63 = vpack.c.bf16 %v2616_v55, %v2616_v55 }
 0xc8c   :  { %3436 = vmatmul.mubr.msk.bf16.vlgmr.msra.gmra.mrb[28].mxu0 %vm1518_vm6, %v2617_v63 }
 0xc8d   :  { %3459 = vmatprep.mubr.msk.bf16.mxu0 %vm4712_vm12, %v3744_v32  ;;  %3452 = vmatpush3.bf16.msra.mxu0 %v3717_v18 }
 0xc8e   :  { %3453 = vmatprep.subr.bf16.mxu0 %v3744_v32 }
 0xc91   :  { %3454 = vmatpush3.bf16.msra.mxu0 %v3718_v19 }
 0xc92   :  { %3455 = vmatprep.subr.bf16.mxu0 %v3744_v32 }
 0xc95   :  { %3456 = vmatpush3.bf16.msra.mxu0 %v3719_v21 }
 0xc96   :  { %3457 = vmatprep.subr.bf16.mxu0 %v3744_v32 }
 0xc99   :  { %3458 = vmatpush3.bf16.msra.mxu0 %v2796_v29 }
 0xd5f   :  { %v2655_v3 = vpop.f32.mrb[28].mxu0 }
 0xd60   :  { %v2661_v62 = vmul.f32 0.041666668, %v2655_v3  ;;  %v3437_v57 = vpop.f32.mrb[29].mxu0 }
 0xd61   :  { %v2658_v58 = vpop.f32.mrb[30].mxu0 }
 0xd62   :  { %3733 = vrsqrt.f32 %v2661_v62  ;;  %v3438_v6 = vpop.f32.mrb[31].mxu0  ;;  %vm2664_vm0 = vcmp.eq.f32.partialorder %v2661_v62, inf  ;;  %v2667_v60 = vand.u32 2147483648, %v2661_v62  ;;  %vm2666_vm2 = vcmp.eq.f32.partialorder %v2661_v62, 0.0 }
 0xd6c   :  { %v3734_v59 = vpop.eup %3733 }
 0xd6d   :  { %v2663_v52 = vmul.f32 %v3734_v59, %v2661_v62 }
 0xd6f   :  { %v2665_v0 = vsel %vm2664_vm0, %v2661_v62, %v2663_v52 }
 0xd70   :  { %v2668_v1 = vsel %vm2666_vm2, %v2667_v60, %v2665_v0 }
 0xd71   :  { %v2669_v2 = vadd.f32 1e-06, %v2668_v1 }
 0xd73   :  { %3735 = vrcp.f32 %v2669_v2 }
 0xd7d   :  { %v3736_v4 = vpop.eup %3735 }
 0xd7e   :  { %v2672_v5 = vpack.c.bf16 %v3736_v4, %v3736_v4 }
 0xd80   :  { %3442 = vmatmul.mubr.msk.bf16.vlgmr.msra.gmra.mrb[52].mxu1 %vm4719_vm5, %v2672_v5 }
 0xd81   :  { %3447 = vmatprep.mubr.msk.bf16.mxu1 %vm4712_vm12, %v3744_v32  ;;  %vm4720_vm12 = vmmov %vm4718_vm1 }
 0xe53   :  { %v2710_v10 = vpop.f32.mrb[52].mxu1 }
 0xe54   :  { %v2716_v11 = vmul.f32 %v2710_v10, %v2671_v8  ;;  %v3443_v12 = vpop.f32.mrb[53].mxu1 }
 0xe55   :  { %v2713_v13 = vpop.f32.mrb[54].mxu1 }
 0xe56   :  { %v2717_v14 = vadd.f32 %v2716_v11, %v240_v9  ;;  %v3444_v15 = vpop.f32.mrb[55].mxu1 }
 0xe58   :  { %v2718_v16 = vmul.f32 %v2717_v14, %v2717_v14 }
 0xe5a   :  { %v2720_v17 = vsel %vm2719_vm11, %v2718_v16, 0.0 }
 0xe5b   :  { %2721 = vadd.xlane.f32.xlu1 %v2720_v17 }
 0xee8   :  { %v2722_v22 = vpop.xlane.xlu1 %2721 }
 0xee9   :  { %v2723_v23 = vmax.f32 %v2722_v22, 1e-24 }
 0xeeb   :  { %3737 = vrsqrt.f32 %v2723_v23 }
 0xef5   :  { %v3738_v24 = vpop.eup %3737 }
 0xef6   :  { %v2725_v25 = vmul.f32 %v3738_v24, %v2717_v14 }
 0xef8   :  { %v2726_v26 = vpack.c.bf16 %v2725_v25, %v2725_v25 }
 0xefa   :  { %v2728_v46 = vsel %vm1995_vm10, %v2726_v26, 0 }
 0xefb   :  { %3446 = vmatpush3.bf16.msra.mxu1 %v2728_v46 }
 0xefe   :  { %3448 = vmatmul.mubr.msk.bf16.vlgmr.msra.gmra.mrb[56].mxu1 %vm4720_vm12, %v4438_v50  ;;  %v232_v50 = vld [vmem:[%s4698_s4 + $0x18] sm:$0xff] }
 0xfd1   :  { %v2764_v32 = vpop.f32.mrb[56].mxu1 }
 0xfd2   :  { %v2770_v30 = vpack.c.bf16 %v2764_v32, %v2764_v32  ;;  %v3449_v31 = vpop.f32.mrb[57].mxu1 }
 0xfd3   :  { %v2767_v33 = vpop.f32.mrb[58].mxu1 }
 0xfd4   :  { %3460 = vmatmul.mubr.msk.bf16.vlgmr.msra.gmra.mrb[32].mxu0 %vm1518_vm6, %v2770_v30  ;;  %v3450_v34 = vpop.f32.mrb[59].mxu1 }
0x10a7   :  { %v2832_v20 = vpop.f32.mrb[32].mxu0 }
0x10a8   :  { %v2838_v36 = vadd.f32 %v2832_v20, %v241_v35  ;;  %v3461_v37 = vpop.f32.mrb[33].mxu0 }
0x10a9   :  { %v2835_v38 = vpop.f32.mrb[34].mxu0 }
0x10aa   :  { %v3462_v39 = vpop.f32.mrb[35].mxu0  ;;  %v2839_v40 = vadd.f32 %v2838_v36, %v232_v50 }
0x10ac   :  { %v2840_v41 = vsel %vm4721_vm3, %v2839_v40, -inf }
0x10ad   :  { %2841 = vmax.xlane.f32.xlu1 %v2840_v41 }
0x113a   :  { %v2842_v42 = vpop.xlane.xlu1 %2841 }
0x113b   :  { %v2843_v44 = vsub.f32 %v2839_v40, %v2842_v42 }
0x113d   :  { %v2844_v47 = vmul.f32 1.442695, %v2843_v44 }
0x113f   :  { %3739 = vpow2.f32 %v2844_v47 }
0x1149   :  { %v3740_v45 = vpop.eup %3739 }
0x114a   :  { %v2846_v43 = vsel %vm4722_vm4, %v3740_v45, 0.0 }
0x114b   :  { %2847 = vadd.xlane.f32.xlu0 %v2846_v43 }
0x11d8   :  { %v2848_v48 = vpop.xlane.xlu0 %2847 }
0x11d9   :  { %3741 = vrcp.f32 %v2848_v48 }
0x11e3   :  { %v3742_v49 = vpop.eup %3741 }
0x11e4   :  { %v2850_v51 = vmul.f32 %v3742_v49, %v3740_v45 }
0x11e6   :  { %v2860_v61 = vrot.slane %v2850_v51, 4  ;;  %v2852_v27 = vsel %vm2851_vm7, %v2850_v51, 0.0 }
0x11e7   :  { %v2853_v53 = vrot.slane %v2852_v27, 4 }
0x11e8   :  { %v2862_v54 = vsel %vm2851_vm7, %v2860_v61, 0.0 }
0x11e9   :  { %v2854_v55 = vadd.f32 %v2853_v53, %v2852_v27  ;;  %v2863_v56 = vrot.slane %v2862_v54, 4 }
0x11eb   :  { %v2855_v63 = vrot.slane %v2854_v55, 2  ;;  %v2864_v3 = vadd.f32 %v2863_v56, %v2862_v54 }
0x11ed   :  { %v2856_v62 = vadd.f32 %v2855_v63, %v2854_v55  ;;  %v2865_v57 = vrot.slane %v2864_v3, 2 }
0x11ef   :  { %v2857_v58 = vrot.slane %v2856_v62, 1  ;;  %v2866_v6 = vadd.f32 %v2865_v57, %v2864_v3 }
0x11f1   :  { %v2867_v59 = vrot.slane %v2866_v6, 1  ;;  %v2858_v52 = vadd.f32 %v2857_v58, %v2856_v62 }
0x11f3   :  { %v2868_v60 = vadd.f32 %v2867_v59, %v2866_v6 }
0x11f5   :  { %v2869_v0 = vsel %vm1995_vm10, %v2858_v52, %v2868_v60 }
0x11f6   :  { %2871 = vrot.lane.b32.xlu1 %v2869_v0, %s3749_s3 }
0x1268   :  { %v2872_v1 = vpop.permute.xlu1 %2871 }
0x1269   :  { %v2874_v2 = vsel %vm1518_vm6, %v2725_v25, %v2872_v1 }
0x126a   :  { %2876 = vst.msk [vmem:[%s4700_s5] sm:$0x3] %vm2875_vm8, %v2874_v2 }

</bundles_post_ra>
